<compile_context>
chip_gen: v6e
topology: v6e:2x2x1
jax: 0.10.0
libtpu: 0.0.40
codegen_flags: <defaults>
</compile_context>

<pallas_src>
import functools

import jax
import jax.numpy as jnp
from jax import lax
from jax.experimental import pallas as pl
from jax.experimental.pallas import tpu as pltpu

EPS = 1e-5  # nn.LayerNorm default eps


@functools.lru_cache(maxsize=None)
def _roll_sign():
    """pltpu.roll is expected to follow jnp.roll semantics (positive shift moves
    rows toward higher indices).  Verify once on the device; fall back to the
    static default (+1) if probing is unavailable (interpret / AOT flows)."""
    try:
        def probe(x_ref, o_ref):
            o_ref[...] = pltpu.roll(x_ref[...], shift=1, axis=0)

        x = jnp.tile(jnp.arange(8, dtype=jnp.float32)[:, None], (1, 128))
        y = pl.pallas_call(
            probe, out_shape=jax.ShapeDtypeStruct((8, 128), jnp.float32))(x)
        # jnp.roll semantics: y[1] == x[0] == 0.
        return 1 if int(y[1, 0]) == 0 else -1
    except Exception:                     # no device / interpret-only environment
        return 1


def decoder_kernel(kernel_sizes, roll_sign, x_ref, mask_ref, *rest):
    """rest = [per-layer (dw, pw, pb, g, b)..., lw, lb, out_ref, conv_scratch]."""
    conv_ref = rest[-1]                    # (Bt*L, E) f32 VMEM scratch
    out_ref = rest[-2]
    w_refs = rest[:-2]
    n_layers = len(kernel_sizes)

    bt, seq, e_dims = x_ref.shape
    m_rows = bt * seq
    inv_e = 1.0 / e_dims

    # Flatten (Bt, L, E) -> (Bt*L, E): channels stay on lanes, matmuls see M=Bt*L.
    h = x_ref[...].astype(jnp.float32).reshape(m_rows, e_dims)
    masked = mask_ref[...].reshape(m_rows, 1) > 0.5     # True == padded row

    for l, ksz in enumerate(kernel_sizes):
        dw_ref = w_refs[5 * l + 0]         # (K, E)  f32  depthwise weights
        pw = w_refs[5 * l + 1][...]        # (E, E)  bf16 pointwise weights
        pb = w_refs[5 * l + 2][...]        # (1, E)  f32  (= db @ pw + pb, folded)
        g = w_refs[5 * l + 3][...]         # (1, E)  f32  LayerNorm weight
        b = w_refs[5 * l + 4][...]         # (1, E)  f32  LayerNorm bias
        pad = ksz // 2

        # Tap weights as (1, E) sublane-broadcast rows straight from the ref.
        dwr = [dw_ref[pl.ds(k, 1), :] for k in range(ksz)]

        # --- depthwise conv along time, one (L, E) slab per batch row ----------
        # Circular roll accumulation (XLU rolls, no boundary selects), then exact
        # zero-padded recompute of only the 2*pad boundary rows.
        for bb in range(bt):
            hb = h[bb * seq:(bb + 1) * seq, :]                 # (L, E) f32
            acc = hb * dwr[pad]                                # center tap
            for k in range(ksz):
                if k == pad:
                    continue
                s = pad - k                                    # tap[t] = h[t - s]
                acc = acc + pltpu.roll(
                    hb, shift=(roll_sign * s) % seq, axis=0) * dwr[k]
            conv_ref[pl.ds(bb * seq, seq), :] = acc
            # top pad rows: taps with t + k - pad < 0 must be dropped
            for t in range(pad):
                row = None
                for k in range(pad - t, ksz):
                    term = hb[t + k - pad:t + k - pad + 1, :] * dwr[k]
                    row = term if row is None else row + term
                conv_ref[pl.ds(bb * seq + t, 1), :] = row
            # bottom pad rows: taps with t + k - pad >= L must be dropped
            for t in range(seq - pad, seq):
                row = None
                for k in range(0, seq - t + pad):
                    term = hb[t + k - pad:t + k - pad + 1, :] * dwr[k]
                    row = term if row is None else row + term
                conv_ref[pl.ds(bb * seq + t, 1), :] = row

        # --- 1x1 pointwise conv (MXU), ReLU, residual, LayerNorm, mask ---------
        conv = jnp.dot(conv_ref[...].astype(jnp.bfloat16), pw,
                       preferred_element_type=jnp.float32) + pb
        conv = jnp.maximum(conv, 0.0)                          # ReLU
        # TODO(synk): Dropout omitted (inference/eval semantics -> identity).
        hs = h + conv
        s1 = jnp.sum(hs, axis=-1, keepdims=True)
        s2 = jnp.sum(hs * hs, axis=-1, keepdims=True)
        mu = s1 * inv_e
        var = jnp.maximum(s2 * inv_e - mu * mu, 0.0)           # clamp cancellation
        h = (hs - mu) * lax.rsqrt(var + EPS) * g + b
        h = jnp.where(masked, 0.0, h)                          # masked_fill(pad, 0)

    lw = w_refs[5 * n_layers + 0][...]     # (E, O)  bf16
    lb = w_refs[5 * n_layers + 1][...]     # (1, O)  f32
    out = jnp.dot(h.astype(jnp.bfloat16), lw,
                  preferred_element_type=jnp.float32) + lb
    out_ref[...] = out.reshape(bt, seq, out_ref.shape[-1]).astype(out_ref.dtype)


def _pick_batch_tile(batch, seq, e_dims, o_dims, vmem_budget=24 << 20):
    """Pick Bt | B: smallest divisor with Bt*L >= 256 (MXU fill), else the
    largest divisor whose activation slabs still fit the budget."""
    divisors = [d for d in range(1, batch + 1) if batch % d == 0]

    def act_bytes(bt_):
        rows = bt_ * seq
        # x block (2 buffers) + out block (2 buffers) + conv scratch + live values
        return rows * e_dims * 4 * 2 + rows * o_dims * 4 * 2 + rows * e_dims * 4 * 3

    fitting = [d for d in divisors if act_bytes(d) <= vmem_budget] or [1]
    for d in fitting:
        if d * seq >= 256:
            return d
    return fitting[-1]


def decoder_forward(encodings, padding_mask, params, *, kernel_sizes):
    """encodings: (B, L, E) f32, padding_mask: (B, L) bool -> (B, L, O) f32."""
    B, L, E = encodings.shape
    odim = params["lw"].shape[1]
    assert all(k % 2 == 1 for k in kernel_sizes), "SepConv needs odd kernel sizes"
    assert L >= max(kernel_sizes), "sequence shorter than conv kernel"

    bt = _pick_batch_tile(B, L, E, odim)
    grid = (B // bt,)
    mask_f = padding_mask.astype(jnp.float32)[..., None]      # (B, L, 1)

    # One-time host-side weight transforms:
    #   * fold depthwise bias through the pointwise conv:  pb' = db @ pw + pb
    #   * ship MXU operands (pointwise / linear weights) as bf16
    flat = []
    for blk in params["blocks"]:
        pb_fold = (jnp.dot(blk["db"], blk["pw"], precision="highest")
                   + blk["pb"]).astype(jnp.float32)
        flat += [blk["dw"], blk["pw"].astype(jnp.bfloat16), pb_fold,
                 blk["g"], blk["b"]]
    flat += [params["lw"].astype(jnp.bfloat16), params["lb"]]

    # Grid-invariant weights: whole-array, single-buffered VMEM residents.
    w_specs = [pl.BlockSpec(memory_space=pltpu.MemorySpace.VMEM) for _ in flat]

    weight_bytes = sum(int(a.size) * a.dtype.itemsize for a in flat)
    act_bytes = (2 * bt * L * E * 4            # x block, double-buffered
                 + 2 * bt * L * 1 * 4          # mask block
                 + 2 * bt * L * odim * 4       # out block
                 + 3 * bt * L * E * 4)         # conv scratch + live h/hs values
    vmem_limit = int(min(100 << 20, max(2 * (weight_bytes + act_bytes), 16 << 20)))

    out = pl.pallas_call(
        functools.partial(decoder_kernel, tuple(kernel_sizes), _roll_sign()),
        out_shape=jax.ShapeDtypeStruct((B, L, odim), jnp.float32),
        grid=grid,
        in_specs=[pl.BlockSpec((bt, L, E), lambda i: (i, 0, 0)),
                  pl.BlockSpec((bt, L, 1), lambda i: (i, 0, 0))] + w_specs,
        out_specs=pl.BlockSpec((bt, L, odim), lambda i: (i, 0, 0)),
        scratch_shapes=[pltpu.VMEM((bt * L, E), jnp.float32)],
        compiler_params=pltpu.CompilerParams(
            dimension_semantics=("parallel",),     # batch tiles are independent
            vmem_limit_bytes=vmem_limit),
    )(encodings, mask_f, *flat)
    return out


def decoder_ref(encodings, padding_mask, params, *, kernel_sizes):
    """Plain-JAX (f32) reference for correctness checking."""
    h = encodings
    L = encodings.shape[1]
    for blk, K in zip(params["blocks"], kernel_sizes):
        pad = K // 2
        hp = jnp.pad(h, ((0, 0), (pad, pad), (0, 0)))
        conv = sum(hp[:, k:k + L, :] * blk["dw"][k][None, None, :]
                   for k in range(K)) + blk["db"]
        conv = jnp.einsum("btc,cf->btf", conv, blk["pw"],
                          precision="highest") + blk["pb"]
        conv = jnp.maximum(conv, 0.0)
        hs = h + conv
        mu = jnp.mean(hs, -1, keepdims=True)
        var = jnp.mean((hs - mu) ** 2, -1, keepdims=True)
        normed = (hs - mu) / jnp.sqrt(var + EPS) * blk["g"] + blk["b"]
        h = jnp.where(padding_mask[..., None], 0.0, normed)
    return jnp.einsum("bte,eo->bto", h, params["lw"],
                      precision="highest") + params["lb"]


def init_params(key, embed_dims, output_dims, kernel_sizes):
    n = lambda k, shape, s=0.1: s * jax.random.normal(k, shape, jnp.float32)
    blocks = []
    for K in kernel_sizes:
        key, *ks = jax.random.split(key, 7)
        blocks.append(dict(
            dw=n(ks[0], (K, embed_dims)),             # depthwise Conv2d weights (K, C)
            db=n(ks[1], (1, embed_dims)),             # depthwise bias
            pw=n(ks[2], (embed_dims, embed_dims)),    # 1x1 pointwise (C_in, C_out)
            pb=n(ks[3], (1, embed_dims)),             # pointwise bias
            g=1.0 + n(ks[4], (1, embed_dims)),        # LayerNorm weight
            b=n(ks[5], (1, embed_dims)),              # LayerNorm bias
        ))
    key, k1, k2 = jax.random.split(key, 3)
    return dict(blocks=blocks,
                lw=n(k1, (embed_dims, output_dims)),  # Linear(E, O) as (E, O)
                lb=n(k2, (1, output_dims)))


if __name__ == "__main__":
    B, L, E, O_DIMS = 2, 32, 128, 128
    KERNEL_SIZES = (3, 5)

    key = jax.random.PRNGKey(0)
    kx, kp, km = jax.random.split(key, 3)
    encodings = jax.random.normal(kx, (B, L, E), jnp.float32)
    padding_mask = jax.random.bernoulli(km, 0.25, (B, L))
    params = init_params(kp, E, O_DIMS, KERNEL_SIZES)

    out = decoder_forward(encodings, padding_mask, params,
                          kernel_sizes=KERNEL_SIZES)
    out = jax.block_until_ready(out)

    ref = decoder_ref(encodings, padding_mask, params,
                      kernel_sizes=KERNEL_SIZES)
    assert out.shape == (B, L, O_DIMS), out.shape
    assert jnp.allclose(out, ref, atol=2.5e-2, rtol=2.5e-2), (
        "max abs err", float(jnp.max(jnp.abs(out - ref))))

    print("KERNEL_OK")
</pallas_src>

<mosaic_0001>
module attributes {stable_mosaic.version = 11 : i64} {
  func.func @probe(%arg0: memref<8x128xf32, #tpu.memory_space<vmem>>, %arg1: memref<8x128xf32, #tpu.memory_space<vmem>>) attributes {dimension_semantics = [], scalar_prefetch = 0 : i64, scratch_operands = 0 : i64, tpu.core_type = #tpu.core_type<tc>} {
    %c0 = arith.constant 0 : index
    %c0_0 = arith.constant 0 : index
    %0 = vector.load %arg0[%c0, %c0_0] : memref<8x128xf32, #tpu.memory_space<vmem>>, vector<8x128xf32>
    %c1_i32 = arith.constant 1 : i32
    %1 = tpu.dynamic_rotate %0 by %c1_i32 dim 0 : vector<8x128xf32>, i32 -> vector<8x128xf32>
    %c0_1 = arith.constant 0 : index
    %c0_2 = arith.constant 0 : index
    %2 = vector.load %arg1[%c0_1, %c0_2] : memref<8x128xf32, #tpu.memory_space<vmem>>, vector<8x128xf32>
    tpu.vector_store %arg1[%c0_1, %c0_2], %1 {strides = array<i32>} : memref<8x128xf32, #tpu.memory_space<vmem>>, vector<8x128xf32>,
    return
  }
}

module attributes {stable_mosaic.version = 11 : i64} {
  func.func @decoder_kernel(%arg0: i32, %arg1: memref<2x32x128xf32, #tpu.memory_space<vmem>>, %arg2: memref<2x32x1xf32, #tpu.memory_space<vmem>>, %arg3: memref<3x128xf32, #tpu.memory_space<vmem>>, %arg4: memref<128x128xbf16, #tpu.memory_space<vmem>>, %arg5: memref<1x128xf32, #tpu.memory_space<vmem>>, %arg6: memref<1x128xf32, #tpu.memory_space<vmem>>, %arg7: memref<1x128xf32, #tpu.memory_space<vmem>>, %arg8: memref<5x128xf32, #tpu.memory_space<vmem>>, %arg9: memref<128x128xbf16, #tpu.memory_space<vmem>>, %arg10: memref<1x128xf32, #tpu.memory_space<vmem>>, %arg11: memref<1x128xf32, #tpu.memory_space<vmem>>, %arg12: memref<1x128xf32, #tpu.memory_space<vmem>>, %arg13: memref<128x128xbf16, #tpu.memory_space<vmem>>, %arg14: memref<1x128xf32, #tpu.memory_space<vmem>>, %arg15: memref<2x32x128xf32, #tpu.memory_space<vmem>>, %arg16: memref<64x128xf32, #tpu.memory_space<vmem>>) attributes {dimension_semantics = [#tpu.dimension_semantics<parallel>], iteration_bounds = array<i64: 1>, scalar_prefetch = 0 : i64, scratch_operands = 1 : i64, tpu.core_type = #tpu.core_type<tc>, window_params = [{transform_indices = @transform_0, window_bounds = array<i64: 2, 32, 128>}, {transform_indices = @transform_1, window_bounds = array<i64: 2, 32, 1>}, {pipeline_mode = #tpu.pipeline_mode<synchronous>, transform_indices = @transform_2, window_bounds = array<i64: 3, 128>}, {pipeline_mode = #tpu.pipeline_mode<synchronous>, transform_indices = @transform_3, window_bounds = array<i64: 128, 128>}, {pipeline_mode = #tpu.pipeline_mode<synchronous>, transform_indices = @transform_4, window_bounds = array<i64: 1, 128>}, {pipeline_mode = #tpu.pipeline_mode<synchronous>, transform_indices = @transform_5, window_bounds = array<i64: 1, 128>}, {pipeline_mode = #tpu.pipeline_mode<synchronous>, transform_indices = @transform_6, window_bounds = array<i64: 1, 128>}, {pipeline_mode = #tpu.pipeline_mode<synchronous>, transform_indices = @transform_7, window_bounds = array<i64: 5, 128>}, {pipeline_mode = #tpu.pipeline_mode<synchronous>, transform_indices = @transform_8, window_bounds = array<i64: 128, 128>}, {pipeline_mode = #tpu.pipeline_mode<synchronous>, transform_indices = @transform_9, window_bounds = array<i64: 1, 128>}, {pipeline_mode = #tpu.pipeline_mode<synchronous>, transform_indices = @transform_10, window_bounds = array<i64: 1, 128>}, {pipeline_mode = #tpu.pipeline_mode<synchronous>, transform_indices = @transform_11, window_bounds = array<i64: 1, 128>}, {pipeline_mode = #tpu.pipeline_mode<synchronous>, transform_indices = @transform_12, window_bounds = array<i64: 128, 128>}, {pipeline_mode = #tpu.pipeline_mode<synchronous>, transform_indices = @transform_13, window_bounds = array<i64: 1, 128>}, {transform_indices = @transform_14, window_bounds = array<i64: 2, 32, 128>}]} {
    %c0 = arith.constant 0 : index
    %c0_0 = arith.constant 0 : index
    %c0_1 = arith.constant 0 : index
    %0 = vector.load %arg1[%c0, %c0_0, %c0_1] : memref<2x32x128xf32, #tpu.memory_space<vmem>>, vector<2x32x128xf32>
    %1 = vector.shape_cast %0 : vector<2x32x128xf32> to vector<64x128xf32>
    %c0_2 = arith.constant 0 : index
    %c0_3 = arith.constant 0 : index
    %c0_4 = arith.constant 0 : index
    %2 = vector.load %arg2[%c0_2, %c0_3, %c0_4] : memref<2x32x1xf32, #tpu.memory_space<vmem>>, vector<2x32x1xf32>
    %3 = vector.shape_cast %2 : vector<2x32x1xf32> to vector<64x1xf32>
    %cst = arith.constant 5.000000e-01 : f32
    %4 = vector.broadcast %cst : f32 to vector<64x1xf32>
    %5 = arith.cmpf ogt, %3, %4 : vector<64x1xf32>
    %c0_5 = arith.constant 0 : index
    %c0_6 = arith.constant 0 : index
    %6 = vector.load %arg4[%c0_5, %c0_6] : memref<128x128xbf16, #tpu.memory_space<vmem>>, vector<128x128xbf16>
    %c0_7 = arith.constant 0 : index
    %c0_8 = arith.constant 0 : index
    %7 = vector.load %arg5[%c0_7, %c0_8] : memref<1x128xf32, #tpu.memory_space<vmem>>, vector<1x128xf32>
    %c0_9 = arith.constant 0 : index
    %c0_10 = arith.constant 0 : index
    %8 = vector.load %arg6[%c0_9, %c0_10] : memref<1x128xf32, #tpu.memory_space<vmem>>, vector<1x128xf32>
    %c0_11 = arith.constant 0 : index
    %c0_12 = arith.constant 0 : index
    %9 = vector.load %arg7[%c0_11, %c0_12] : memref<1x128xf32, #tpu.memory_space<vmem>>, vector<1x128xf32>
    %c0_13 = arith.constant 0 : index
    %c0_14 = arith.constant 0 : index
    %10 = vector.load %arg3[%c0_13, %c0_14] : memref<3x128xf32, #tpu.memory_space<vmem>>, vector<1x128xf32>
    %c1 = arith.constant 1 : index
    %c0_15 = arith.constant 0 : index
    %11 = vector.load %arg3[%c1, %c0_15] : memref<3x128xf32, #tpu.memory_space<vmem>>, vector<1x128xf32>
    %c2 = arith.constant 2 : index
    %c0_16 = arith.constant 0 : index
    %12 = vector.load %arg3[%c2, %c0_16] : memref<3x128xf32, #tpu.memory_space<vmem>>, vector<1x128xf32>
    %13 = vector.extract_strided_slice %1 {offsets = [0, 0], sizes = [32, 128], strides = [1, 1]} : vector<64x128xf32> to vector<32x128xf32>
    %14 = vector.broadcast %11 : vector<1x128xf32> to vector<32x128xf32>
    %15 = arith.mulf %13, %14 : vector<32x128xf32>
    %c1_i32 = arith.constant 1 : i32
    %16 = tpu.dynamic_rotate %13 by %c1_i32 dim 0 : vector<32x128xf32>, i32 -> vector<32x128xf32>
    %17 = vector.broadcast %10 : vector<1x128xf32> to vector<32x128xf32>
    %18 = arith.mulf %16, %17 : vector<32x128xf32>
    %19 = arith.addf %15, %18 : vector<32x128xf32>
    %c31_i32 = arith.constant 31 : i32
    %20 = tpu.dynamic_rotate %13 by %c31_i32 dim 0 : vector<32x128xf32>, i32 -> vector<32x128xf32>
    %21 = vector.broadcast %12 : vector<1x128xf32> to vector<32x128xf32>
    %22 = arith.mulf %20, %21 : vector<32x128xf32>
    %23 = arith.addf %19, %22 : vector<32x128xf32>
    %c0_17 = arith.constant 0 : index
    %c0_18 = arith.constant 0 : index
    %24 = vector.load %arg16[%c0_17, %c0_18] : memref<64x128xf32, #tpu.memory_space<vmem>>, vector<32x128xf32>
    tpu.vector_store %arg16[%c0_17, %c0_18], %23 {strides = array<i32>} : memref<64x128xf32, #tpu.memory_space<vmem>>, vector<32x128xf32>,
    %25 = vector.extract_strided_slice %13 {offsets = [0, 0], sizes = [1, 128], strides = [1, 1]} : vector<32x128xf32> to vector<1x128xf32>
    %26 = arith.mulf %25, %11 : vector<1x128xf32>
    %27 = vector.extract_strided_slice %13 {offsets = [1, 0], sizes = [1, 128], strides = [1, 1]} : vector<32x128xf32> to vector<1x128xf32>
    %28 = arith.mulf %27, %12 : vector<1x128xf32>
    %29 = arith.addf %26, %28 : vector<1x128xf32>
    %c0_19 = arith.constant 0 : index
    %c0_20 = arith.constant 0 : index
    %30 = vector.load %arg16[%c0_19, %c0_20] : memref<64x128xf32, #tpu.memory_space<vmem>>, vector<1x128xf32>
    tpu.vector_store %arg16[%c0_19, %c0_20], %29 {strides = array<i32>} : memref<64x128xf32, #tpu.memory_space<vmem>>, vector<1x128xf32>,
    %31 = vector.extract_strided_slice %13 {offsets = [30, 0], sizes = [1, 128], strides = [1, 1]} : vector<32x128xf32> to vector<1x128xf32>
    %32 = arith.mulf %31, %10 : vector<1x128xf32>
    %33 = vector.extract_strided_slice %13 {offsets = [31, 0], sizes = [1, 128], strides = [1, 1]} : vector<32x128xf32> to vector<1x128xf32>
    %34 = arith.mulf %33, %11 : vector<1x128xf32>
    %35 = arith.addf %32, %34 : vector<1x128xf32>
    %c31 = arith.constant 31 : index
    %c0_21 = arith.constant 0 : index
    %36 = vector.load %arg16[%c31, %c0_21] : memref<64x128xf32, #tpu.memory_space<vmem>>, vector<1x128xf32>
    tpu.vector_store %arg16[%c31, %c0_21], %35 {strides = array<i32>} : memref<64x128xf32, #tpu.memory_space<vmem>>, vector<1x128xf32>,
    %37 = vector.extract_strided_slice %1 {offsets = [32, 0], sizes = [32, 128], strides = [1, 1]} : vector<64x128xf32> to vector<32x128xf32>
    %38 = vector.broadcast %11 : vector<1x128xf32> to vector<32x128xf32>
    %39 = arith.mulf %37, %38 : vector<32x128xf32>
    %c1_i32_22 = arith.constant 1 : i32
    %40 = tpu.dynamic_rotate %37 by %c1_i32_22 dim 0 : vector<32x128xf32>, i32 -> vector<32x128xf32>
    %41 = vector.broadcast %10 : vector<1x128xf32> to vector<32x128xf32>
    %42 = arith.mulf %40, %41 : vector<32x128xf32>
    %43 = arith.addf %39, %42 : vector<32x128xf32>
    %c31_i32_23 = arith.constant 31 : i32
    %44 = tpu.dynamic_rotate %37 by %c31_i32_23 dim 0 : vector<32x128xf32>, i32 -> vector<32x128xf32>
    %45 = vector.broadcast %12 : vector<1x128xf32> to vector<32x128xf32>
    %46 = arith.mulf %44, %45 : vector<32x128xf32>
    %47 = arith.addf %43, %46 : vector<32x128xf32>
    %c32 = arith.constant 32 : index
    %c0_24 = arith.constant 0 : index
    %48 = vector.load %arg16[%c32, %c0_24] : memref<64x128xf32, #tpu.memory_space<vmem>>, vector<32x128xf32>
    tpu.vector_store %arg16[%c32, %c0_24], %47 {strides = array<i32>} : memref<64x128xf32, #tpu.memory_space<vmem>>, vector<32x128xf32>,
    %49 = vector.extract_strided_slice %37 {offsets = [0, 0], sizes = [1, 128], strides = [1, 1]} : vector<32x128xf32> to vector<1x128xf32>
    %50 = arith.mulf %49, %11 : vector<1x128xf32>
    %51 = vector.extract_strided_slice %37 {offsets = [1, 0], sizes = [1, 128], strides = [1, 1]} : vector<32x128xf32> to vector<1x128xf32>
    %52 = arith.mulf %51, %12 : vector<1x128xf32>
    %53 = arith.addf %50, %52 : vector<1x128xf32>
    %c32_25 = arith.constant 32 : index
    %c0_26 = arith.constant 0 : index
    %54 = vector.load %arg16[%c32_25, %c0_26] : memref<64x128xf32, #tpu.memory_space<vmem>>, vector<1x128xf32>
    tpu.vector_store %arg16[%c32_25, %c0_26], %53 {strides = array<i32>} : memref<64x128xf32, #tpu.memory_space<vmem>>, vector<1x128xf32>,
    %55 = vector.extract_strided_slice %37 {offsets = [30, 0], sizes = [1, 128], strides = [1, 1]} : vector<32x128xf32> to vector<1x128xf32>
    %56 = arith.mulf %55, %10 : vector<1x128xf32>
    %57 = vector.extract_strided_slice %37 {offsets = [31, 0], sizes = [1, 128], strides = [1, 1]} : vector<32x128xf32> to vector<1x128xf32>
    %58 = arith.mulf %57, %11 : vector<1x128xf32>
    %59 = arith.addf %56, %58 : vector<1x128xf32>
    %c63 = arith.constant 63 : index
    %c0_27 = arith.constant 0 : index
    %60 = vector.load %arg16[%c63, %c0_27] : memref<64x128xf32, #tpu.memory_space<vmem>>, vector<1x128xf32>
    tpu.vector_store %arg16[%c63, %c0_27], %59 {strides = array<i32>} : memref<64x128xf32, #tpu.memory_space<vmem>>, vector<1x128xf32>,
    %c0_28 = arith.constant 0 : index
    %c0_29 = arith.constant 0 : index
    %61 = vector.load %arg16[%c0_28, %c0_29] : memref<64x128xf32, #tpu.memory_space<vmem>>, vector<64x128xf32>
    %62 = arith.truncf %61 : vector<64x128xf32> to vector<64x128xbf16>
    %cst_30 = arith.constant dense<0.000000e+00> : vector<64x128xf32>
    %63 = tpu.matmul %62, %6, %cst_30 {dimension_numbers = #tpu.dot_dimension_numbers<[1], [0], [0], [1], [0, 0, 1, 1], [], []>} : vector<64x128xbf16>, vector<128x128xbf16>, vector<64x128xf32> -> vector<64x128xf32>
    %64 = vector.broadcast %7 : vector<1x128xf32> to vector<64x128xf32>
    %65 = arith.addf %63, %64 : vector<64x128xf32>
    %cst_31 = arith.constant 0.000000e+00 : f32
    %66 = vector.broadcast %cst_31 : f32 to vector<64x128xf32>
    %67 = arith.maximumf %65, %66 : vector<64x128xf32>
    %68 = arith.addf %1, %67 : vector<64x128xf32>
    %cst_32 = arith.constant dense<0.000000e+00> : vector<64xf32>
    %69 = vector.multi_reduction <add>, %68, %cst_32 [1] : vector<64x128xf32> to vector<64xf32>
    %70 = vector.shape_cast %69 : vector<64xf32> to vector<64x1xf32>
    %71 = arith.mulf %68, %68 : vector<64x128xf32>
    %cst_33 = arith.constant dense<0.000000e+00> : vector<64xf32>
    %72 = vector.multi_reduction <add>, %71, %cst_33 [1] : vector<64x128xf32> to vector<64xf32>
    %73 = vector.shape_cast %72 : vector<64xf32> to vector<64x1xf32>
    %cst_34 = arith.constant 7.812500e-03 : f32
    %74 = vector.broadcast %cst_34 : f32 to vector<64x1xf32>
    %75 = arith.mulf %70, %74 : vector<64x1xf32>
    %cst_35 = arith.constant 7.812500e-03 : f32
    %76 = vector.broadcast %cst_35 : f32 to vector<64x1xf32>
    %77 = arith.mulf %73, %76 : vector<64x1xf32>
    %78 = arith.mulf %75, %75 : vector<64x1xf32>
    %79 = arith.subf %77, %78 : vector<64x1xf32>
    %cst_36 = arith.constant 0.000000e+00 : f32
    %80 = vector.broadcast %cst_36 : f32 to vector<64x1xf32>
    %81 = arith.maximumf %79, %80 : vector<64x1xf32>
    %82 = vector.broadcast %75 : vector<64x1xf32> to vector<64x128xf32>
    %83 = arith.subf %68, %82 : vector<64x128xf32>
    %cst_37 = arith.constant 9.99999974E-6 : f32
    %84 = vector.broadcast %cst_37 : f32 to vector<64x1xf32>
    %85 = arith.addf %81, %84 : vector<64x1xf32>
    %86 = math.rsqrt %85 : vector<64x1xf32>
    %87 = vector.broadcast %86 : vector<64x1xf32> to vector<64x128xf32>
    %88 = arith.mulf %83, %87 : vector<64x128xf32>
    %89 = vector.broadcast %8 : vector<1x128xf32> to vector<64x128xf32>
    %90 = arith.mulf %88, %89 : vector<64x128xf32>
    %91 = vector.broadcast %9 : vector<1x128xf32> to vector<64x128xf32>
    %92 = arith.addf %90, %91 : vector<64x128xf32>
    %cst_38 = arith.constant 0.000000e+00 : f32
    %93 = vector.shape_cast %5 : vector<64x1xi1> to vector<64x1xi1>
    %94 = vector.broadcast %93 : vector<64x1xi1> to vector<64x128xi1>
    %95 = vector.broadcast %cst_38 : f32 to vector<64x128xf32>
    %96 = arith.select %94, %95, %92 : vector<64x128xi1>, vector<64x128xf32>
    %c0_39 = arith.constant 0 : index
    %c0_40 = arith.constant 0 : index
    %97 = vector.load %arg9[%c0_39, %c0_40] : memref<128x128xbf16, #tpu.memory_space<vmem>>, vector<128x128xbf16>
    %c0_41 = arith.constant 0 : index
    %c0_42 = arith.constant 0 : index
    %98 = vector.load %arg10[%c0_41, %c0_42] : memref<1x128xf32, #tpu.memory_space<vmem>>, vector<1x128xf32>
    %c0_43 = arith.constant 0 : index
    %c0_44 = arith.constant 0 : index
    %99 = vector.load %arg11[%c0_43, %c0_44] : memref<1x128xf32, #tpu.memory_space<vmem>>, vector<1x128xf32>
    %c0_45 = arith.constant 0 : index
    %c0_46 = arith.constant 0 : index
    %100 = vector.load %arg12[%c0_45, %c0_46] : memref<1x128xf32, #tpu.memory_space<vmem>>, vector<1x128xf32>
    %c0_47 = arith.constant 0 : index
    %c0_48 = arith.constant 0 : index
    %101 = vector.load %arg8[%c0_47, %c0_48] : memref<5x128xf32, #tpu.memory_space<vmem>>, vector<1x128xf32>
    %c1_49 = arith.constant 1 : index
    %c0_50 = arith.constant 0 : index
    %102 = vector.load %arg8[%c1_49, %c0_50] : memref<5x128xf32, #tpu.memory_space<vmem>>, vector<1x128xf32>
    %c2_51 = arith.constant 2 : index
    %c0_52 = arith.constant 0 : index
    %103 = vector.load %arg8[%c2_51, %c0_52] : memref<5x128xf32, #tpu.memory_space<vmem>>, vector<1x128xf32>
    %c3 = arith.constant 3 : index
    %c0_53 = arith.constant 0 : index
    %104 = vector.load %arg8[%c3, %c0_53] : memref<5x128xf32, #tpu.memory_space<vmem>>, vector<1x128xf32>
    %c4 = arith.constant 4 : index
    %c0_54 = arith.constant 0 : index
    %105 = vector.load %arg8[%c4, %c0_54] : memref<5x128xf32, #tpu.memory_space<vmem>>, vector<1x128xf32>
    %106 = vector.extract_strided_slice %96 {offsets = [0, 0], sizes = [32, 128], strides = [1, 1]} : vector<64x128xf32> to vector<32x128xf32>
    %107 = vector.broadcast %103 : vector<1x128xf32> to vector<32x128xf32>
    %108 = arith.mulf %106, %107 : vector<32x128xf32>
    %c2_i32 = arith.constant 2 : i32
    %109 = tpu.dynamic_rotate %106 by %c2_i32 dim 0 : vector<32x128xf32>, i32 -> vector<32x128xf32>
    %110 = vector.broadcast %101 : vector<1x128xf32> to vector<32x128xf32>
    %111 = arith.mulf %109, %110 : vector<32x128xf32>
    %112 = arith.addf %108, %111 : vector<32x128xf32>
    %c1_i32_55 = arith.constant 1 : i32
    %113 = tpu.dynamic_rotate %106 by %c1_i32_55 dim 0 : vector<32x128xf32>, i32 -> vector<32x128xf32>
    %114 = vector.broadcast %102 : vector<1x128xf32> to vector<32x128xf32>
    %115 = arith.mulf %113, %114 : vector<32x128xf32>
    %116 = arith.addf %112, %115 : vector<32x128xf32>
    %c31_i32_56 = arith.constant 31 : i32
    %117 = tpu.dynamic_rotate %106 by %c31_i32_56 dim 0 : vector<32x128xf32>, i32 -> vector<32x128xf32>
    %118 = vector.broadcast %104 : vector<1x128xf32> to vector<32x128xf32>
    %119 = arith.mulf %117, %118 : vector<32x128xf32>
    %120 = arith.addf %116, %119 : vector<32x128xf32>
    %c30_i32 = arith.constant 30 : i32
    %121 = tpu.dynamic_rotate %106 by %c30_i32 dim 0 : vector<32x128xf32>, i32 -> vector<32x128xf32>
    %122 = vector.broadcast %105 : vector<1x128xf32> to vector<32x128xf32>
    %123 = arith.mulf %121, %122 : vector<32x128xf32>
    %124 = arith.addf %120, %123 : vector<32x128xf32>
    %c0_57 = arith.constant 0 : index
    %c0_58 = arith.constant 0 : index
    %125 = vector.load %arg16[%c0_57, %c0_58] : memref<64x128xf32, #tpu.memory_space<vmem>>, vector<32x128xf32>
    tpu.vector_store %arg16[%c0_57, %c0_58], %124 {strides = array<i32>} : memref<64x128xf32, #tpu.memory_space<vmem>>, vector<32x128xf32>,
    %126 = vector.extract_strided_slice %106 {offsets = [0, 0], sizes = [1, 128], strides = [1, 1]} : vector<32x128xf32> to vector<1x128xf32>
    %127 = arith.mulf %126, %103 : vector<1x128xf32>
    %128 = vector.extract_strided_slice %106 {offsets = [1, 0], sizes = [1, 128], strides = [1, 1]} : vector<32x128xf32> to vector<1x128xf32>
    %129 = arith.mulf %128, %104 : vector<1x128xf32>
    %130 = arith.addf %127, %129 : vector<1x128xf32>
    %131 = vector.extract_strided_slice %106 {offsets = [2, 0], sizes = [1, 128], strides = [1, 1]} : vector<32x128xf32> to vector<1x128xf32>
    %132 = arith.mulf %131, %105 : vector<1x128xf32>
    %133 = arith.addf %130, %132 : vector<1x128xf32>
    %c0_59 = arith.constant 0 : index
    %c0_60 = arith.constant 0 : index
    %134 = vector.load %arg16[%c0_59, %c0_60] : memref<64x128xf32, #tpu.memory_space<vmem>>, vector<1x128xf32>
    tpu.vector_store %arg16[%c0_59, %c0_60], %133 {strides = array<i32>} : memref<64x128xf32, #tpu.memory_space<vmem>>, vector<1x128xf32>,
    %135 = vector.extract_strided_slice %106 {offsets = [0, 0], sizes = [1, 128], strides = [1, 1]} : vector<32x128xf32> to vector<1x128xf32>
    %136 = arith.mulf %135, %102 : vector<1x128xf32>
    %137 = vector.extract_strided_slice %106 {offsets = [1, 0], sizes = [1, 128], strides = [1, 1]} : vector<32x128xf32> to vector<1x128xf32>
    %138 = arith.mulf %137, %103 : vector<1x128xf32>
    %139 = arith.addf %136, %138 : vector<1x128xf32>
    %140 = vector.extract_strided_slice %106 {offsets = [2, 0], sizes = [1, 128], strides = [1, 1]} : vector<32x128xf32> to vector<1x128xf32>
    %141 = arith.mulf %140, %104 : vector<1x128xf32>
    %142 = arith.addf %139, %141 : vector<1x128xf32>
    %143 = vector.extract_strided_slice %106 {offsets = [3, 0], sizes = [1, 128], strides = [1, 1]} : vector<32x128xf32> to vector<1x128xf32>
    %144 = arith.mulf %143, %105 : vector<1x128xf32>
    %145 = arith.addf %142, %144 : vector<1x128xf32>
    %c1_61 = arith.constant 1 : index
    %c0_62 = arith.constant 0 : index
    %146 = vector.load %arg16[%c1_61, %c0_62] : memref<64x128xf32, #tpu.memory_space<vmem>>, vector<1x128xf32>
    tpu.vector_store %arg16[%c1_61, %c0_62], %145 {strides = array<i32>} : memref<64x128xf32, #tpu.memory_space<vmem>>, vector<1x128xf32>,
    %147 = vector.extract_strided_slice %106 {offsets = [28, 0], sizes = [1, 128], strides = [1, 1]} : vector<32x128xf32> to vector<1x128xf32>
    %148 = arith.mulf %147, %101 : vector<1x128xf32>
    %149 = vector.extract_strided_slice %106 {offsets = [29, 0], sizes = [1, 128], strides = [1, 1]} : vector<32x128xf32> to vector<1x128xf32>
    %150 = arith.mulf %149, %102 : vector<1x128xf32>
    %151 = arith.addf %148, %150 : vector<1x128xf32>
    %152 = vector.extract_strided_slice %106 {offsets = [30, 0], sizes = [1, 128], strides = [1, 1]} : vector<32x128xf32> to vector<1x128xf32>
    %153 = arith.mulf %152, %103 : vector<1x128xf32>
    %154 = arith.addf %151, %153 : vector<1x128xf32>
    %155 = vector.extract_strided_slice %106 {offsets = [31, 0], sizes = [1, 128], strides = [1, 1]} : vector<32x128xf32> to vector<1x128xf32>
    %156 = arith.mulf %155, %104 : vector<1x128xf32>
    %157 = arith.addf %154, %156 : vector<1x128xf32>
    %c30 = arith.constant 30 : index
    %c0_63 = arith.constant 0 : index
    %158 = vector.load %arg16[%c30, %c0_63] : memref<64x128xf32, #tpu.memory_space<vmem>>, vector<1x128xf32>
    tpu.vector_store %arg16[%c30, %c0_63], %157 {strides = array<i32>} : memref<64x128xf32, #tpu.memory_space<vmem>>, vector<1x128xf32>,
    %159 = vector.extract_strided_slice %106 {offsets = [29, 0], sizes = [1, 128], strides = [1, 1]} : vector<32x128xf32> to vector<1x128xf32>
    %160 = arith.mulf %159, %101 : vector<1x128xf32>
    %161 = vector.extract_strided_slice %106 {offsets = [30, 0], sizes = [1, 128], strides = [1, 1]} : vector<32x128xf32> to vector<1x128xf32>
    %162 = arith.mulf %161, %102 : vector<1x128xf32>
    %163 = arith.addf %160, %162 : vector<1x128xf32>
    %164 = vector.extract_strided_slice %106 {offsets = [31, 0], sizes = [1, 128], strides = [1, 1]} : vector<32x128xf32> to vector<1x128xf32>
    %165 = arith.mulf %164, %103 : vector<1x128xf32>
    %166 = arith.addf %163, %165 : vector<1x128xf32>
    %c31_64 = arith.constant 31 : index
    %c0_65 = arith.constant 0 : index
    %167 = vector.load %arg16[%c31_64, %c0_65] : memref<64x128xf32, #tpu.memory_space<vmem>>, vector<1x128xf32>
    tpu.vector_store %arg16[%c31_64, %c0_65], %166 {strides = array<i32>} : memref<64x128xf32, #tpu.memory_space<vmem>>, vector<1x128xf32>,
    %168 = vector.extract_strided_slice %96 {offsets = [32, 0], sizes = [32, 128], strides = [1, 1]} : vector<64x128xf32> to vector<32x128xf32>
    %169 = vector.broadcast %103 : vector<1x128xf32> to vector<32x128xf32>
    %170 = arith.mulf %168, %169 : vector<32x128xf32>
    %c2_i32_66 = arith.constant 2 : i32
    %171 = tpu.dynamic_rotate %168 by %c2_i32_66 dim 0 : vector<32x128xf32>, i32 -> vector<32x128xf32>
    %172 = vector.broadcast %101 : vector<1x128xf32> to vector<32x128xf32>
    %173 = arith.mulf %171, %172 : vector<32x128xf32>
    %174 = arith.addf %170, %173 : vector<32x128xf32>
    %c1_i32_67 = arith.constant 1 : i32
    %175 = tpu.dynamic_rotate %168 by %c1_i32_67 dim 0 : vector<32x128xf32>, i32 -> vector<32x128xf32>
    %176 = vector.broadcast %102 : vector<1x128xf32> to vector<32x128xf32>
    %177 = arith.mulf %175, %176 : vector<32x128xf32>
    %178 = arith.addf %174, %177 : vector<32x128xf32>
    %c31_i32_68 = arith.constant 31 : i32
    %179 = tpu.dynamic_rotate %168 by %c31_i32_68 dim 0 : vector<32x128xf32>, i32 -> vector<32x128xf32>
    %180 = vector.broadcast %104 : vector<1x128xf32> to vector<32x128xf32>
    %181 = arith.mulf %179, %180 : vector<32x128xf32>
    %182 = arith.addf %178, %181 : vector<32x128xf32>
    %c30_i32_69 = arith.constant 30 : i32
    %183 = tpu.dynamic_rotate %168 by %c30_i32_69 dim 0 : vector<32x128xf32>, i32 -> vector<32x128xf32>
    %184 = vector.broadcast %105 : vector<1x128xf32> to vector<32x128xf32>
    %185 = arith.mulf %183, %184 : vector<32x128xf32>
    %186 = arith.addf %182, %185 : vector<32x128xf32>
    %c32_70 = arith.constant 32 : index
    %c0_71 = arith.constant 0 : index
    %187 = vector.load %arg16[%c32_70, %c0_71] : memref<64x128xf32, #tpu.memory_space<vmem>>, vector<32x128xf32>
    tpu.vector_store %arg16[%c32_70, %c0_71], %186 {strides = array<i32>} : memref<64x128xf32, #tpu.memory_space<vmem>>, vector<32x128xf32>,
    %188 = vector.extract_strided_slice %168 {offsets = [0, 0], sizes = [1, 128], strides = [1, 1]} : vector<32x128xf32> to vector<1x128xf32>
    %189 = arith.mulf %188, %103 : vector<1x128xf32>
    %190 = vector.extract_strided_slice %168 {offsets = [1, 0], sizes = [1, 128], strides = [1, 1]} : vector<32x128xf32> to vector<1x128xf32>
    %191 = arith.mulf %190, %104 : vector<1x128xf32>
    %192 = arith.addf %189, %191 : vector<1x128xf32>
    %193 = vector.extract_strided_slice %168 {offsets = [2, 0], sizes = [1, 128], strides = [1, 1]} : vector<32x128xf32> to vector<1x128xf32>
    %194 = arith.mulf %193, %105 : vector<1x128xf32>
    %195 = arith.addf %192, %194 : vector<1x128xf32>
    %c32_72 = arith.constant 32 : index
    %c0_73 = arith.constant 0 : index
    %196 = vector.load %arg16[%c32_72, %c0_73] : memref<64x128xf32, #tpu.memory_space<vmem>>, vector<1x128xf32>
    tpu.vector_store %arg16[%c32_72, %c0_73], %195 {strides = array<i32>} : memref<64x128xf32, #tpu.memory_space<vmem>>, vector<1x128xf32>,
    %197 = vector.extract_strided_slice %168 {offsets = [0, 0], sizes = [1, 128], strides = [1, 1]} : vector<32x128xf32> to vector<1x128xf32>
    %198 = arith.mulf %197, %102 : vector<1x128xf32>
    %199 = vector.extract_strided_slice %168 {offsets = [1, 0], sizes = [1, 128], strides = [1, 1]} : vector<32x128xf32> to vector<1x128xf32>
    %200 = arith.mulf %199, %103 : vector<1x128xf32>
    %201 = arith.addf %198, %200 : vector<1x128xf32>
    %202 = vector.extract_strided_slice %168 {offsets = [2, 0], sizes = [1, 128], strides = [1, 1]} : vector<32x128xf32> to vector<1x128xf32>
    %203 = arith.mulf %202, %104 : vector<1x128xf32>
    %204 = arith.addf %201, %203 : vector<1x128xf32>
    %205 = vector.extract_strided_slice %168 {offsets = [3, 0], sizes = [1, 128], strides = [1, 1]} : vector<32x128xf32> to vector<1x128xf32>
    %206 = arith.mulf %205, %105 : vector<1x128xf32>
    %207 = arith.addf %204, %206 : vector<1x128xf32>
    %c33 = arith.constant 33 : index
    %c0_74 = arith.constant 0 : index
    %208 = vector.load %arg16[%c33, %c0_74] : memref<64x128xf32, #tpu.memory_space<vmem>>, vector<1x128xf32>
    tpu.vector_store %arg16[%c33, %c0_74], %207 {strides = array<i32>} : memref<64x128xf32, #tpu.memory_space<vmem>>, vector<1x128xf32>,
    %209 = vector.extract_strided_slice %168 {offsets = [28, 0], sizes = [1, 128], strides = [1, 1]} : vector<32x128xf32> to vector<1x128xf32>
    %210 = arith.mulf %209, %101 : vector<1x128xf32>
    %211 = vector.extract_strided_slice %168 {offsets = [29, 0], sizes = [1, 128], strides = [1, 1]} : vector<32x128xf32> to vector<1x128xf32>
    %212 = arith.mulf %211, %102 : vector<1x128xf32>
    %213 = arith.addf %210, %212 : vector<1x128xf32>
    %214 = vector.extract_strided_slice %168 {offsets = [30, 0], sizes = [1, 128], strides = [1, 1]} : vector<32x128xf32> to vector<1x128xf32>
    %215 = arith.mulf %214, %103 : vector<1x128xf32>
    %216 = arith.addf %213, %215 : vector<1x128xf32>
    %217 = vector.extract_strided_slice %168 {offsets = [31, 0], sizes = [1, 128], strides = [1, 1]} : vector<32x128xf32> to vector<1x128xf32>
    %218 = arith.mulf %217, %104 : vector<1x128xf32>
    %219 = arith.addf %216, %218 : vector<1x128xf32>
    %c62 = arith.constant 62 : index
    %c0_75 = arith.constant 0 : index
    %220 = vector.load %arg16[%c62, %c0_75] : memref<64x128xf32, #tpu.memory_space<vmem>>, vector<1x128xf32>
    tpu.vector_store %arg16[%c62, %c0_75], %219 {strides = array<i32>} : memref<64x128xf32, #tpu.memory_space<vmem>>, vector<1x128xf32>,
    %221 = vector.extract_strided_slice %168 {offsets = [29, 0], sizes = [1, 128], strides = [1, 1]} : vector<32x128xf32> to vector<1x128xf32>
    %222 = arith.mulf %221, %101 : vector<1x128xf32>
    %223 = vector.extract_strided_slice %168 {offsets = [30, 0], sizes = [1, 128], strides = [1, 1]} : vector<32x128xf32> to vector<1x128xf32>
    %224 = arith.mulf %223, %102 : vector<1x128xf32>
    %225 = arith.addf %222, %224 : vector<1x128xf32>
    %226 = vector.extract_strided_slice %168 {offsets = [31, 0], sizes = [1, 128], strides = [1, 1]} : vector<32x128xf32> to vector<1x128xf32>
    %227 = arith.mulf %226, %103 : vector<1x128xf32>
    %228 = arith.addf %225, %227 : vector<1x128xf32>
    %c63_76 = arith.constant 63 : index
    %c0_77 = arith.constant 0 : index
    %229 = vector.load %arg16[%c63_76, %c0_77] : memref<64x128xf32, #tpu.memory_space<vmem>>, vector<1x128xf32>
    tpu.vector_store %arg16[%c63_76, %c0_77], %228 {strides = array<i32>} : memref<64x128xf32, #tpu.memory_space<vmem>>, vector<1x128xf32>,
    %c0_78 = arith.constant 0 : index
    %c0_79 = arith.constant 0 : index
    %230 = vector.load %arg16[%c0_78, %c0_79] : memref<64x128xf32, #tpu.memory_space<vmem>>, vector<64x128xf32>
    %231 = arith.truncf %230 : vector<64x128xf32> to vector<64x128xbf16>
    %cst_80 = arith.constant dense<0.000000e+00> : vector<64x128xf32>
    %232 = tpu.matmul %231, %97, %cst_80 {dimension_numbers = #tpu.dot_dimension_numbers<[1], [0], [0], [1], [0, 0, 1, 1], [], []>} : vector<64x128xbf16>, vector<128x128xbf16>, vector<64x128xf32> -> vector<64x128xf32>
    %233 = vector.broadcast %98 : vector<1x128xf32> to vector<64x128xf32>
    %234 = arith.addf %232, %233 : vector<64x128xf32>
    %cst_81 = arith.constant 0.000000e+00 : f32
    %235 = vector.broadcast %cst_81 : f32 to vector<64x128xf32>
    %236 = arith.maximumf %234, %235 : vector<64x128xf32>
    %237 = arith.addf %96, %236 : vector<64x128xf32>
    %cst_82 = arith.constant dense<0.000000e+00> : vector<64xf32>
    %238 = vector.multi_reduction <add>, %237, %cst_82 [1] : vector<64x128xf32> to vector<64xf32>
    %239 = vector.shape_cast %238 : vector<64xf32> to vector<64x1xf32>
    %240 = arith.mulf %237, %237 : vector<64x128xf32>
    %cst_83 = arith.constant dense<0.000000e+00> : vector<64xf32>
    %241 = vector.multi_reduction <add>, %240, %cst_83 [1] : vector<64x128xf32> to vector<64xf32>
    %242 = vector.shape_cast %241 : vector<64xf32> to vector<64x1xf32>
    %cst_84 = arith.constant 7.812500e-03 : f32
    %243 = vector.broadcast %cst_84 : f32 to vector<64x1xf32>
    %244 = arith.mulf %239, %243 : vector<64x1xf32>
    %cst_85 = arith.constant 7.812500e-03 : f32
    %245 = vector.broadcast %cst_85 : f32 to vector<64x1xf32>
    %246 = arith.mulf %242, %245 : vector<64x1xf32>
    %247 = arith.mulf %244, %244 : vector<64x1xf32>
    %248 = arith.subf %246, %247 : vector<64x1xf32>
    %cst_86 = arith.constant 0.000000e+00 : f32
    %249 = vector.broadcast %cst_86 : f32 to vector<64x1xf32>
    %250 = arith.maximumf %248, %249 : vector<64x1xf32>
    %251 = vector.broadcast %244 : vector<64x1xf32> to vector<64x128xf32>
    %252 = arith.subf %237, %251 : vector<64x128xf32>
    %cst_87 = arith.constant 9.99999974E-6 : f32
    %253 = vector.broadcast %cst_87 : f32 to vector<64x1xf32>
    %254 = arith.addf %250, %253 : vector<64x1xf32>
    %255 = math.rsqrt %254 : vector<64x1xf32>
    %256 = vector.broadcast %255 : vector<64x1xf32> to vector<64x128xf32>
    %257 = arith.mulf %252, %256 : vector<64x128xf32>
    %258 = vector.broadcast %99 : vector<1x128xf32> to vector<64x128xf32>
    %259 = arith.mulf %257, %258 : vector<64x128xf32>
    %260 = vector.broadcast %100 : vector<1x128xf32> to vector<64x128xf32>
    %261 = arith.addf %259, %260 : vector<64x128xf32>
    %cst_88 = arith.constant 0.000000e+00 : f32
    %262 = vector.shape_cast %5 : vector<64x1xi1> to vector<64x1xi1>
    %263 = vector.broadcast %262 : vector<64x1xi1> to vector<64x128xi1>
    %264 = vector.broadcast %cst_88 : f32 to vector<64x128xf32>
    %265 = arith.select %263, %264, %261 : vector<64x128xi1>, vector<64x128xf32>
    %c0_89 = arith.constant 0 : index
    %c0_90 = arith.constant 0 : index
    %266 = vector.load %arg13[%c0_89, %c0_90] : memref<128x128xbf16, #tpu.memory_space<vmem>>, vector<128x128xbf16>
    %c0_91 = arith.constant 0 : index
    %c0_92 = arith.constant 0 : index
    %267 = vector.load %arg14[%c0_91, %c0_92] : memref<1x128xf32, #tpu.memory_space<vmem>>, vector<1x128xf32>
    %268 = arith.truncf %265 : vector<64x128xf32> to vector<64x128xbf16>
    %cst_93 = arith.constant dense<0.000000e+00> : vector<64x128xf32>
    %269 = tpu.matmul %268, %266, %cst_93 {dimension_numbers = #tpu.dot_dimension_numbers<[1], [0], [0], [1], [0, 0, 1, 1], [], []>} : vector<64x128xbf16>, vector<128x128xbf16>, vector<64x128xf32> -> vector<64x128xf32>
    %270 = vector.broadcast %267 : vector<1x128xf32> to vector<64x128xf32>
    %271 = arith.addf %269, %270 : vector<64x128xf32>
    %272 = vector.shape_cast %271 : vector<64x128xf32> to vector<2x32x128xf32>
    %c0_94 = arith.constant 0 : index
    %c0_95 = arith.constant 0 : index
    %c0_96 = arith.constant 0 : index
    %273 = vector.load %arg15[%c0_94, %c0_95, %c0_96] : memref<2x32x128xf32, #tpu.memory_space<vmem>>, vector<2x32x128xf32>
    tpu.vector_store %arg15[%c0_94, %c0_95, %c0_96], %272 {strides = array<i32>} : memref<2x32x128xf32, #tpu.memory_space<vmem>>, vector<2x32x128xf32>,
    return
  }
  func.func @transform_0(%arg0: i32) -> (i32, i32, i32) {
    %c0_i32 = arith.constant 0 : i32
    %c0_i32_0 = arith.constant 0 : i32
    %c0_i32_1 = arith.constant 0 : i32
    return %arg0, %c0_i32, %c0_i32_0 : i32, i32, i32
  }
  func.func @transform_1(%arg0: i32) -> (i32, i32, i32) {
    %c0_i32 = arith.constant 0 : i32
    %c0_i32_0 = arith.constant 0 : i32
    %c0_i32_1 = arith.constant 0 : i32
    return %arg0, %c0_i32, %c0_i32_0 : i32, i32, i32
  }
  func.func @transform_2(%arg0: i32) -> (i32, i32) {
    %c0_i32 = arith.constant 0 : i32
    %c0_i32_0 = arith.constant 0 : i32
    %c0_i32_1 = arith.constant 0 : i32
    return %c0_i32, %c0_i32_0 : i32, i32
  }
  func.func @transform_3(%arg0: i32) -> (i32, i32) {
    %c0_i32 = arith.constant 0 : i32
    %c0_i32_0 = arith.constant 0 : i32
    %c0_i32_1 = arith.constant 0 : i32
    return %c0_i32, %c0_i32_0 : i32, i32
  }
  func.func @transform_4(%arg0: i32) -> (i32, i32) {
    %c0_i32 = arith.constant 0 : i32
    %c0_i32_0 = arith.constant 0 : i32
    %c0_i32_1 = arith.constant 0 : i32
    return %c0_i32, %c0_i32_0 : i32, i32
  }
  func.func @transform_5(%arg0: i32) -> (i32, i32) {
    %c0_i32 = arith.constant 0 : i32
    %c0_i32_0 = arith.constant 0 : i32
    %c0_i32_1 = arith.constant 0 : i32
    return %c0_i32, %c0_i32_0 : i32, i32
  }
  func.func @transform_6(%arg0: i32) -> (i32, i32) {
    %c0_i32 = arith.constant 0 : i32
    %c0_i32_0 = arith.constant 0 : i32
    %c0_i32_1 = arith.constant 0 : i32
    return %c0_i32, %c0_i32_0 : i32, i32
  }
  func.func @transform_7(%arg0: i32) -> (i32, i32) {
    %c0_i32 = arith.constant 0 : i32
    %c0_i32_0 = arith.constant 0 : i32
    %c0_i32_1 = arith.constant 0 : i32
    return %c0_i32, %c0_i32_0 : i32, i32
  }
  func.func @transform_8(%arg0: i32) -> (i32, i32) {
    %c0_i32 = arith.constant 0 : i32
    %c0_i32_0 = arith.constant 0 : i32
    %c0_i32_1 = arith.constant 0 : i32
    return %c0_i32, %c0_i32_0 : i32, i32
  }
  func.func @transform_9(%arg0: i32) -> (i32, i32) {
    %c0_i32 = arith.constant 0 : i32
    %c0_i32_0 = arith.constant 0 : i32
    %c0_i32_1 = arith.constant 0 : i32
    return %c0_i32, %c0_i32_0 : i32, i32
  }
  func.func @transform_10(%arg0: i32) -> (i32, i32) {
    %c0_i32 = arith.constant 0 : i32
    %c0_i32_0 = arith.constant 0 : i32
    %c0_i32_1 = arith.constant 0 : i32
    return %c0_i32, %c0_i32_0 : i32, i32
  }
  func.func @transform_11(%arg0: i32) -> (i32, i32) {
    %c0_i32 = arith.constant 0 : i32
    %c0_i32_0 = arith.constant 0 : i32
    %c0_i32_1 = arith.constant 0 : i32
    return %c0_i32, %c0_i32_0 : i32, i32
  }
  func.func @transform_12(%arg0: i32) -> (i32, i32) {
    %c0_i32 = arith.constant 0 : i32
    %c0_i32_0 = arith.constant 0 : i32
    %c0_i32_1 = arith.constant 0 : i32
    return %c0_i32, %c0_i32_0 : i32, i32
  }
  func.func @transform_13(%arg0: i32) -> (i32, i32) {
    %c0_i32 = arith.constant 0 : i32
    %c0_i32_0 = arith.constant 0 : i32
    %c0_i32_1 = arith.constant 0 : i32
    return %c0_i32, %c0_i32_0 : i32, i32
  }
  func.func @transform_14(%arg0: i32) -> (i32, i32, i32) {
    %c0_i32 = arith.constant 0 : i32
    %c0_i32_0 = arith.constant 0 : i32
    %c0_i32_1 = arith.constant 0 : i32
    return %arg0, %c0_i32, %c0_i32_0 : i32, i32, i32
  }
}

</mosaic_0001>

<bundles_post_ra>
// kernel: tpu_custom_call.1
= control target key start
LH: loop header
LB: loop body
LE: loop exit
PB: predicated region body
PF: predicated region fallthrough
CT: control target
= control target key end

     0   :  { %6 = vsyncpa [#allocation3], 0  ;;  %s103_s0 = inlined_call_operand.hbm [shape: f32[8,128], index: 0, kind: input, shape index: {}]   ;;  %s104_s1 = inlined_call_operand.hbm [shape: f32[8,128], index: 1, kind: output, shape index: {}]  }
   0x1   :  { %7 = vsyncpa [#allocation4], 0  ;;  %s85_s6 = smov [#allocation2]  }
   0x2   :  { %s14_s7 = sshll.u32 %s85_s6, 4  ;;  %s15_s7 = int_to_ptr.vmem [resolvable:$true] %s14_s7 }
   0x3   :  { %s49_s8 = scalar_lea.vmem %s15_s7, 128  ;;  %p54_p1 = scmp.lt.s32.totalorder %s15_s7, %s15_s7 }
   0x4   :  { %p50_p0 = scmp.ne.s32.totalorder %s15_s7, %s49_s8  ;;  %p55_p2 = scmp.lt.s32.totalorder %s49_s8, %s49_s8 }
   0x6   :  { %p56_p3 = por %p55_p2, %p54_p1 }
   0x8   :  { %p57_p4 = pnand %p56_p3, %p50_p0 }
   0xa   :  { %60 = shalt.err (!%p57_p4)
}
   0xb   :  { %17 = dma.hbm_to_vmem [thread:$0]  %s103_s0, 128, %s15_s7, [#allocation3]  }
   0xc   :  { %81 = dma.done.wait [#allocation3], 128  }
   0xd   :  { %82 = vsyncadd [#allocation3], 4294967168  ;;  %s86_s11 = smov [#allocation5]   ;;  %v21_v0 = vld [vmem:[#allocation2] sm:$0xff] }
   0xe   :  { %s30_s12 = sshll.u32 %s86_s11, 4  ;;  %v22_v1 = vrot.slane %v21_v0, 7  ;;  %s31_s12 = int_to_ptr.vmem [resolvable:$true] %s30_s12 }
   0xf   :  { %s61_s13 = scalar_lea.vmem %s31_s12, 128  ;;  %p66_p6 = scmp.lt.s32.totalorder %s31_s12, %s31_s12 }
  0x10   :  { %23 = vst [vmem:[#allocation5] sm:$0xff] %v22_v1  ;;  %p62_p5 = scmp.ne.s32.totalorder %s31_s12, %s61_s13  ;;  %p67_p7 = scmp.lt.s32.totalorder %s61_s13, %s61_s13 }
  0x12   :  { %p68_p8 = por %p67_p7, %p66_p6 }
  0x14   :  { %p69_p9 = pnand %p68_p8, %p62_p5 }
  0x16   :  { %72 = shalt.err (!%p69_p9)
}
  0x17   :  { %33 = dma.vmem_to_hbm [thread:$0]  %s31_s12, 128, %s104_s1, [#allocation4]  }
  0x18   :  { %83 = dma.done.wait [#allocation4], 128  }
  0x19   :  { %84 = vsyncadd [#allocation4], 4294967168 }
  0x1a   :  { %37 = vsyncpa [#allocation3], 1 }
  0x1b   :  { %38 = vsyncpa [#allocation4], 1 }

// kernel: tpu_custom_call.1
= control target key start
LH: loop header
LB: loop body
LE: loop exit
PB: predicated region body
PF: predicated region fallthrough
CT: control target
= control target key end

     0   :  { %19 = vsyncpa [#allocation4], 0  ;;  %s2797_s0 = inlined_call_operand.vmem [shape: f32[2,32,128], index: 0, kind: input, shape index: {}]   ;;  %s2798_s1 = inlined_call_operand.vmem [shape: f32[2,32,1], index: 1, kind: input, shape index: {}]   ;;  %s2799_s2 = inlined_call_operand.hbm [shape: f32[3,128], index: 2, kind: input, shape index: {}]   ;;  %s2800_s3 = inlined_call_operand.hbm [shape: bf16[128,128], index: 3, kind: input, shape index: {}]   ;;  %s2801_s4 = inlined_call_operand.vmem [shape: f32[1,128], index: 4, kind: input, shape index: {}]   ;;  %s2802_s5 = inlined_call_operand.vmem [shape: f32[1,128], index: 5, kind: input, shape index: {}]   ;;  %s2803_s6 = inlined_call_operand.vmem [shape: f32[1,128], index: 6, kind: input, shape index: {}]   ;;  %s2804_s7 = inlined_call_operand.vmem [shape: f32[5,128], index: 7, kind: input, shape index: {}]   ;;  %s2805_s8 = inlined_call_operand.hbm [shape: bf16[128,128], index: 8, kind: input, shape index: {}]   ;;  %s2806_s9 = inlined_call_operand.vmem [shape: f32[1,128], index: 9, kind: input, shape index: {}]   ;;  %s2807_s10 = inlined_call_operand.vmem [shape: f32[1,128], index: 10, kind: input, shape index: {}]   ;;  %s2808_s11 = inlined_call_operand.vmem [shape: f32[1,128], index: 11, kind: input, shape index: {}]   ;;  %s2809_s12 = inlined_call_operand.hbm [shape: bf16[128,128], index: 12, kind: input, shape index: {}]   ;;  %s2810_s13 = inlined_call_operand.vmem [shape: f32[1,128], index: 13, kind: input, shape index: {}]   ;;  %s2811_s14 = inlined_call_operand.hbm [shape: f32[2,32,128], index: 14, kind: output, shape index: {}]  }
   0x1   :  { %20 = vsyncpa [#allocation7], 0 }
   0x2   :  { %21 = vsyncpa [#allocation10], 0 }
   0x3   :  { %22 = vsyncpa [#allocation5], 0  ;;  %s1764_s29 = smov [#allocation6]  }
   0x4   :  { %s42_s30 = sshll.u32 %s1764_s29, 4  ;;  %s43_s30 = int_to_ptr.vmem [resolvable:$true] %s42_s30 }
   0x5   :  { %s1664_s15 = scalar_lea.vmem %s43_s30, 1024  ;;  %p1669_p1 = scmp.lt.s32.totalorder %s43_s30, %s43_s30 }
   0x6   :  { %p1665_p0 = scmp.ne.s32.totalorder %s43_s30, %s1664_s15  ;;  %p1670_p2 = scmp.lt.s32.totalorder %s1664_s15, %s1664_s15 }
   0x8   :  { %p1671_p3 = por %p1670_p2, %p1669_p1 }
   0xa   :  { %p1672_p4 = pnand %p1671_p3, %p1665_p0 }
   0xc   :  { %1675 = shalt.err (!%p1672_p4)
}
   0xd   :  { %s1765_s16 = smov 64   ;;  %s1766_s17 = smov 4  }
   0xe   :  { %48 = dma.hbm_to_vmem [thread:$0]  %s2800_s3, 1024, %s43_s30, [#allocation7], %s1765_s16, %s1765_s16, %s1766_s17  }
   0xf   :  { %s1767_s20 = smov [#allocation3]   ;;  %s1768_s22 = smov [#allocation8]  }
  0x10   :  { %s33_s21 = sshll.u32 %s1767_s20, 4  ;;  %s62_s23 = sshll.u32 %s1768_s22, 4  ;;  %s34_s21 = int_to_ptr.vmem [resolvable:$true] %s33_s21  ;;  %s63_s23 = int_to_ptr.vmem [resolvable:$true] %s62_s23 }
  0x11   :  { %s1684_s24 = scalar_lea.vmem %s34_s21, 64  ;;  %p1689_p6 = scmp.lt.s32.totalorder %s34_s21, %s34_s21 }
  0x12   :  { %p1685_p5 = scmp.ne.s32.totalorder %s34_s21, %s1684_s24  ;;  %p1690_p7 = scmp.lt.s32.totalorder %s1684_s24, %s1684_s24 }
  0x14   :  { %p1691_p8 = por %p1690_p7, %p1689_p6 }
  0x16   :  { %p1692_p9 = pnand %p1691_p8, %p1685_p5 }
  0x18   :  { %1695 = shalt.err (!%p1692_p9)
}
  0x19   :  { %36 = dma.hbm_to_vmem [thread:$0]  %s2799_s2, 64, %s34_s21, [#allocation4]  }
  0x1a   :  { %s1704_s27 = scalar_lea.vmem %s63_s23, 1024  ;;  %p1709_p11 = scmp.lt.s32.totalorder %s63_s23, %s63_s23 }
  0x1b   :  { %p1705_p10 = scmp.ne.s32.totalorder %s63_s23, %s1704_s27  ;;  %p1710_p12 = scmp.lt.s32.totalorder %s1704_s27, %s1704_s27 }
  0x1d   :  { %p1711_p13 = por %p1710_p12, %p1709_p11 }
  0x1f   :  { %p1712_p0 = pnand %p1711_p13, %p1705_p10 }
  0x21   :  { %1715 = shalt.err (!%p1712_p0)
}
  0x22   :  { %68 = dma.hbm_to_vmem [thread:$0]  %s2805_s8, 1024, %s63_s23, [#allocation7], %s1765_s16, %s1765_s16, %s1766_s17  }
  0x23   :  { %s1769_s29 = smov [#allocation9]  }
  0x24   :  { %s80_s30 = sshll.u32 %s1769_s29, 4  ;;  %s81_s30 = int_to_ptr.vmem [resolvable:$true] %s80_s30 }
  0x25   :  { %s1724_s15 = scalar_lea.vmem %s81_s30, 1024  ;;  %p1729_p2 = scmp.lt.s32.totalorder %s81_s30, %s81_s30 }
  0x26   :  { %p1725_p1 = scmp.ne.s32.totalorder %s81_s30, %s1724_s15  ;;  %p1730_p3 = scmp.lt.s32.totalorder %s1724_s15, %s1724_s15 }
  0x28   :  { %p1731_p4 = por %p1730_p3, %p1729_p2 }
  0x2a   :  { %p1732_p5 = pnand %p1731_p4, %p1725_p1 }
  0x2c   :  { %1735 = shalt.err (!%p1732_p5)
}
  0x2d   :  { %86 = dma.hbm_to_vmem [thread:$0]  %s2809_s12, 1024, %s81_s30, [#allocation10], %s1765_s16, %s1765_s16, %s1766_s17  }
  0x2e   :  { %1756 = dma.done.wait [#allocation4], 64  }
  0x2f   :  { %1757 = vsyncadd [#allocation4], 4294967232 }
  0x30   :  { %1758 = dma.done.wait [#allocation7], 2048  }
  0x31   :  { %1759 = vsyncadd [#allocation7], 4294965248 }
  0x32   :  { %1760 = dma.done.wait [#allocation10], 1024  }
  0x33   :  { %1761 = vsyncadd [#allocation10], 4294966272  ;;  %v148_v0 = vlaneseq  ;;  %v1600_v1 = vld [vmem:[#allocation6 + $0x38] sm:$0xff]   ;;  %v1601_v2 = vld [vmem:[#allocation6 + $0x30] sm:$0xff]   ;;  %s1771_s20 = smov [#allocation11]  }
  0x34   :  { %1500 = vmatprep.subr.bf16.mxu0 %v1600_v1  ;;  %v1602_v4 = vld [vmem:[#allocation6 + $0x28] sm:$0xff]   ;;  %v1603_v6 = vld [vmem:[#allocation6 + $0x20] sm:$0xff]   ;;  %v1890_v9 = vld [vmem:[%s2797_s0 + $0x18] sm:$0xff] }
  0x35   :  { %v1870_v3 = vshrl.u32 %v148_v0, 7  ;;  %1501 = vmatpush3.bf16.msra.mxu0 %v1600_v1  ;;  %v1878_v7 = vld [vmem:[%s2797_s0] sm:$0xff]  ;;  %v1883_v8 = vld [vmem:[%s2797_s0 + $0x8] sm:$0xff]  ;;  %v1900_v13 = vld [vmem:[%s2797_s0 + $0x10] sm:$0xff]  ;;  %v159_v17 = vrot.slane %v1890_v9, 7  ;;  %v182_v39 = vrot.slane %v1890_v9, 1 }
  0x36   :  { %1502 = vmatprep.subr.bf16.mxu0 %v1601_v2  ;;  %v1892_v10 = vld [vmem:[#allocation3] sm:$0x1]  ;;  %v1894_v11 = vld [vmem:[#allocation3 + $0x1] sm:$0x1]  ;;  %v156_v12 = vrot.slane %v1878_v7, 7  ;;  %v157_v16 = vrot.slane %v1883_v8, 7 }
  0x37   :  { %v1873_v5 = vsub.s32 0, %v1870_v3  ;;  %vm162_vm0 = vcmp.lt.s32.totalorder %v1870_v3, 1  ;;  %vm183_vm1 = vcmp.lt.s32.totalorder %v1870_v3, 7  ;;  %v1902_v14 = vld [vmem:[#allocation3 + $0x2] sm:$0x1]  ;;  %v179_v20 = vrot.slane %v1878_v7, 1 }
  0x38   :  { %v1604_v19 = vld [vmem:[#allocation6 + $0x18] sm:$0xff]   ;;  %v180_v21 = vrot.slane %v1883_v8, 1  ;;  %v181_v22 = vrot.slane %v1900_v13, 1  ;;  %v165_v25 = vsel %vm162_vm0, %v156_v12, %v157_v16  ;;  %v166_v26 = vsel %vm162_vm0, %v159_v17, %v156_v12  ;;  %v1605_v36 = vld [vmem:[#allocation6 + $0x10] sm:$0xff]   ;;  %v1606_v46 = vld [vmem:[#allocation6 + $0x8] sm:$0xff]  }
  0x39   :  { %1503 = vmatpush3.bf16.msra.mxu0 %v1601_v2  ;;  %v1906_v15 = vrot.slane %v1894_v11, %v1873_v5  ;;  %v1912_v18 = vrot.slane %v1892_v10, %v1873_v5  ;;  %v1919_v23 = vrot.slane %v1902_v14, %v1873_v5  ;;  %v206_v31 = vrot.slane %v1902_v14, 7  ;;  %v1952_v45 = vld [vmem:[%s2797_s0 + $0x20] sm:$0xff]  ;;  %v1963_v51 = vld [vmem:[%s2797_s0 + $0x28] sm:$0xff]  ;;  %v1968_v52 = vld [vmem:[%s2797_s0 + $0x38] sm:$0xff] }
  0x3a   :  { %1504 = vmatprep.subr.bf16.mxu0 %v1602_v4  ;;  %v186_v28 = vsel %vm183_vm1, %v179_v20, %v180_v21  ;;  %v185_v29 = vsel %vm183_vm1, %v180_v21, %v181_v22  ;;  %v204_v35 = vmul.f32 %v1894_v11, %v1878_v7  ;;  %v158_v38 = vrot.slane %v1900_v13, 7  ;;  %v1607_v1 = vld [vmem:[#allocation6] sm:$0xff]  }
  0x3b   :  { %v152_v24 = vmul.f32 %v1906_v15, %v1878_v7  ;;  %v171_v27 = vmul.f32 %v1912_v18, %v166_v26  ;;  %v192_v30 = vmul.f32 %v1919_v23, %v186_v28  ;;  %v153_v32 = vmul.f32 %v1906_v15, %v1883_v8 }
  0x3c   :  { %v172_v33 = vmul.f32 %v1912_v18, %v165_v25  ;;  %v208_v37 = vmul.f32 %v206_v31, %v1878_v7  ;;  %v215_v40 = vrot.slane %v1892_v10, 2  ;;  %v193_v41 = vmul.f32 %v1919_v23, %v185_v29 }
  0x3d   :  { %1505 = vmatpush3.bf16.msra.mxu0 %v1602_v4  ;;  %v175_v34 = vadd.f32 %v171_v27, %v152_v24  ;;  %v155_v43 = vmul.f32 %v1906_v15, %v1890_v9  ;;  %v219_v44 = vrot.slane %v1894_v11, 1  ;;  %v154_v48 = vmul.f32 %v1906_v15, %v1900_v13 }
  0x3e   :  { %1506 = vmatprep.subr.bf16.mxu0 %v1603_v6  ;;  %v210_v47 = vrot.slane %v208_v37, 1  ;;  %v163_v49 = vsel %vm162_vm0, %v158_v38, %v159_v17  ;;  %v164_v50 = vsel %vm162_vm0, %v157_v16, %v158_v38  ;;  %v184_v55 = vsel %vm183_vm1, %v181_v22, %v182_v39 }
  0x3f   :  { %v196_v42 = vadd.f32 %v192_v30, %v175_v34  ;;  %v173_v53 = vmul.f32 %v1912_v18, %v164_v50  ;;  %v174_v54 = vmul.f32 %v1912_v18, %v163_v49  ;;  %v187_v56 = vsel %vm183_vm1, %v182_v39, %v179_v20  ;;  %v1991_v20 = vld [vmem:[%s2797_s0 + $0x30] sm:$0xff] }
  0x40   :  { %v212_v57 = vadd.f32 %v210_v47, %v204_v35  ;;  %v195_v58 = vmul.f32 %v1919_v23, %v187_v56  ;;  %v217_v59 = vmul.f32 %v215_v40, %v1890_v9  ;;  %v221_v60 = vmul.f32 %v219_v44, %v1890_v9 }
  0x41   :  { %1507 = vmatpush3.bf16.msra.mxu0 %v1603_v6  ;;  %200 = vst [vmem:[#allocation2] sm:$0xff] %v196_v42  ;;  %v176_v61 = vadd.f32 %v172_v33, %v153_v32  ;;  %v178_v62 = vadd.f32 %v174_v54, %v155_v43  ;;  %v227_v63 = vmul.f32 %v1906_v15, %v1952_v45  ;;  %v231_v0 = vrot.slane %v1952_v45, 7 }
  0x42   :  { %1508 = vmatprep.subr.bf16.mxu0 %v1604_v19  ;;  %213 = vst [vmem:[#allocation2] sm:$0x1] %v212_v57  ;;  %v223_v2 = vrot.slane %v221_v60, 1  ;;  %v232_v4 = vrot.slane %v1963_v51, 7  ;;  %v234_v6 = vrot.slane %v1968_v52, 7  ;;  %v247_v12 = vrot.slane %v1952_v45, 1 }
  0x43   :  { %v177_v16 = vadd.f32 %v173_v53, %v154_v48  ;;  %v194_v17 = vmul.f32 %v1919_v23, %v184_v55  ;;  %v248_v21 = vrot.slane %v1963_v51, 1  ;;  %v197_v26 = vadd.f32 %v193_v41, %v176_v61 }
  0x44   :  { %v225_v22 = vadd.f32 %v223_v2, %v217_v59  ;;  %v237_v24 = vsel %vm162_vm0, %v231_v0, %v232_v4  ;;  %v238_v25 = vsel %vm162_vm0, %v234_v6, %v231_v0  ;;  %v249_v28 = vrot.slane %v1991_v20, 1 }
  0x45   :  { %1509 = vmatpush3.bf16.msra.mxu0 %v1604_v19  ;;  %v199_v19 = vadd.f32 %v195_v58, %v178_v62  ;;  %v239_v27 = vmul.f32 %v238_v25, %v1912_v18  ;;  %v253_v29 = vsel %vm183_vm1, %v247_v12, %v248_v21  ;;  %v228_v30 = vmul.f32 %v1906_v15, %v1963_v51 }
  0x46   :  { %1510 = vmatprep.subr.bf16.mxu0 %v1605_v36  ;;  %v255_v32 = vmul.f32 %v253_v29, %v1919_v23  ;;  %v267_v33 = vmul.f32 %v1894_v11, %v1952_v45  ;;  %v268_v34 = vmul.f32 %v206_v31, %v1952_v45  ;;  %v198_v35 = vadd.f32 %v194_v17, %v177_v16  ;;  %v1413_v17 = vld [vmem:[%s2801_s4] ss:$0 sm:$0xff] }
  0x47   :  { %203 = vst [vmem:[#allocation2 + $0x18] sm:$0xff] %v199_v19  ;;  %v243_v37 = vadd.f32 %v239_v27, %v227_v63  ;;  %v233_v38 = vrot.slane %v1991_v20, 7  ;;  %v230_v41 = vmul.f32 %v1906_v15, %v1968_v52  ;;  %v250_v42 = vrot.slane %v1968_v52, 1 }
  0x48   :  { %226 = vst [vmem:[#allocation2 + $0x19] sm:$0x40] %v225_v22  ;;  %v270_v39 = vrot.slane %v268_v34, 1  ;;  %v275_v11 = vmul.f32 %v219_v44, %v1968_v52  ;;  %v252_v14 = vsel %vm183_vm1, %v248_v21, %v249_v28  ;;  %v274_v47 = vmul.f32 %v215_v40, %v1968_v52 }
  0x49   :  { %1511 = vmatpush3.bf16.msra.mxu0 %v1605_v36  ;;  %v240_v36 = vmul.f32 %v237_v24, %v1912_v18  ;;  %v281_v43 = vld [vmem:[#allocation2] sm:$0xff]  ;;  %v259_v31 = vadd.f32 %v255_v32, %v243_v37  ;;  %v236_v50 = vsel %vm162_vm0, %v232_v4, %v233_v38  ;;  %v254_v44 = vsel %vm183_vm1, %v250_v42, %v247_v12 }
  0x4a   :  { %1512 = vmatprep.subr.bf16.mxu0 %v1606_v46  ;;  %v289_v48 = vpack.c.bf16 %v197_v26, %v281_v43  ;;  %v272_v49 = vadd.f32 %v270_v39, %v267_v33  ;;  %v277_v54 = vrot.slane %v275_v11, 1  ;;  %v256_v56 = vmul.f32 %v252_v14, %v1919_v23 }
  0x4b   :  { %263 = vst [vmem:[#allocation2 + $0x20] sm:$0xff] %v259_v31  ;;  %v244_v55 = vadd.f32 %v240_v36, %v228_v30  ;;  %v258_v40 = vmul.f32 %v254_v44, %v1919_v23  ;;  %v229_v58 = vmul.f32 %v1906_v15, %v1991_v20  ;;  %v241_v59 = vmul.f32 %v236_v50, %v1912_v18 }
  0x4c   :  { %1516 = vmatprep.mubr.bf16.mxu0 %v289_v48  ;;  %273 = vst [vmem:[#allocation2 + $0x20] sm:$0x1] %v272_v49  ;;  %v279_v60 = vadd.f32 %v277_v54, %v274_v47  ;;  %v251_v62 = vsel %vm183_vm1, %v249_v28, %v250_v42  ;;  %vm652_vm13 = vcmp.lt.s32.totalorder %v1870_v3, 2 }
  0x4d   :  { %1513 = vmatpush3.bf16.msra.mxu0 %v1606_v46  ;;  %v235_v46 = vsel %vm162_vm0, %v233_v38, %v234_v6  ;;  %v260_v0 = vadd.f32 %v256_v56, %v244_v55  ;;  %v257_v2 = vmul.f32 %v251_v62, %v1919_v23 }
  0x4e   :  { %1514 = vmatprep.subr.bf16.mxu0 %v1607_v1  ;;  %v242_v53 = vmul.f32 %v235_v46, %v1912_v18  ;;  %v1770_v18 = vmov 0  }
  0x4f   :  { %v284_v57 = vld [vmem:[#allocation2 + $0x18] sm:$0xff]  ;;  %1599 = vset.pattern.permute.xlu1 %v1770_v18  ;;  %1598 = vset.pattern.permute.xlu0 %v1770_v18 }
  0x50   :  { %v246_v10 = vadd.f32 %v242_v53, %v230_v41  ;;  %v290_v61 = vpack.c.bf16 %v284_v57, %v198_v35  ;;  %v112_v57 = vld [vmem:[%s2798_s1 + $0x10] sm:$0xff] }
  0x51   :  { %1515 = vmatpush3.bf16.msra.mxu0 %v1607_v1  ;;  %v245_v1 = vadd.f32 %v241_v59, %v229_v58  ;;  %vm120_vm5 = vcmp.gt.f32.partialorder %v112_v57, 0.5  ;;  %v1609_v59 = vld [vmem:[#allocation8 + $0x30] sm:$0xff]  }
  0x52   :  { %v262_v63 = vadd.f32 %v258_v40, %v246_v10  ;;  %v110_v10 = vld [vmem:[%s2798_s1] sm:$0xff]  ;;  %v570_v62 = vsel %vm120_vm5, 1, %v1770_v18 }
  0x53   :  { %v285_v4 = vld [vmem:[#allocation2 + $0x20] sm:$0xff]  ;;  %v261_v12 = vadd.f32 %v257_v2, %v245_v1  ;;  %vm118_vm4 = vcmp.gt.f32.partialorder %v110_v10, 0.5  ;;  %v115_v1 = vld [vmem:[%s2798_s1 + $0x28] sm:$0xff] }
  0x54   :  { %1517 = vmatmul.mubr.bf16.vlgmr.msra.gmra.mxu0 %v290_v61  ;;  %266 = vst [vmem:[#allocation2 + $0x38] sm:$0xff] %v262_v63  ;;  %v291_v6 = vpack.c.bf16 %v260_v0, %v285_v4  ;;  %v1608_v40 = vld [vmem:[#allocation8 + $0x38] sm:$0xff]   ;;  %v568_v61 = vsel %vm118_vm4, 1, %v1770_v18  ;;  %vm123_vm8 = vcmp.gt.f32.partialorder %v115_v1, 0.5  ;;  %v116_v4 = vld [vmem:[%s2798_s1 + $0x30] sm:$0xff] }
  0x55   :  { %280 = vst [vmem:[#allocation2 + $0x39] sm:$0x40] %v279_v60  ;;  %1524 = vmatprep.subr.bf16.mxu1 %v1608_v40  ;;  %v114_v60 = vld [vmem:[%s2798_s1 + $0x20] sm:$0xff]  ;;  %v117_v63 = vld [vmem:[%s2798_s1 + $0x38] sm:$0xff]  ;;  %vm124_vm9 = vcmp.gt.f32.partialorder %v116_v4, 0.5 }
  0x56   :  { %1520 = vmatprep.mubr.bf16.mxu0 %v291_v6  ;;  %1525 = vmatpush3.bf16.msra.mxu1 %v1608_v40  ;;  %vm122_vm6 = vcmp.gt.f32.partialorder %v114_v60, 0.5  ;;  %vm125_vm7 = vcmp.gt.f32.partialorder %v117_v63, 0.5  ;;  %v573_v6 = vsel %vm123_vm8, 1, %v1770_v18  ;;  %v2148_v1 = vld [vmem:[%s2804_s7] sm:$0x1] }
  0x57   :  { %1526 = vmatprep.subr.bf16.mxu1 %v1609_v59  ;;  %v572_v0 = vsel %vm122_vm6, 1, %v1770_v18  ;;  %v575_v2 = vsel %vm125_vm7, 1, %v1770_v18  ;;  %v2158_v4 = vld [vmem:[%s2804_s7 + $0x2] sm:$0x1]  ;;  %vm2818_vm7 = vcmp.lt.s32.totalorder %v1870_v3, 6 }
  0x5a   :  { %1527 = vmatpush3.bf16.msra.mxu1 %v1609_v59 }
  0x5c   :  { %v288_v15 = vld [vmem:[#allocation2 + $0x38] sm:$0xff] }
  0x5d   :  { %v292_v16 = vpack.c.bf16 %v288_v15, %v261_v12  ;;  %v574_v12 = vsel %vm124_vm9, 1, %v1770_v18  ;;  %v1610_v15 = vld [vmem:[#allocation8 + $0x28] sm:$0xff]  }
  0x5e   :  { %1528 = vmatprep.subr.bf16.mxu1 %v1610_v15 }
  0x5f   :  { %1521 = vmatmul.mubr.bf16.gmra.mxu0 %v292_v16  ;;  %1529 = vmatpush3.bf16.msra.mxu1 %v1610_v15  ;;  %v1611_v16 = vld [vmem:[#allocation8 + $0x20] sm:$0xff]  }
  0x60   :  { %1530 = vmatprep.subr.bf16.mxu1 %v1611_v16 }
  0x63   :  { %1531 = vmatpush3.bf16.msra.mxu1 %v1611_v16 }
 0x114   :  { %v1518_v19 = vpop.f32.mrf.mxu0 }
 0x115   :  { %v390_v21 = vadd.f32 %v1518_v19, %v1413_v17  ;;  %v1613_v19 = vld [vmem:[#allocation8 + $0x10] sm:$0xff]  }
 0x116   :  { %v381_v23 = vpop.f32.mrf.mxu0 }
 0x117   :  { %v414_v22 = vmax.f32 %v390_v21, 0.0  ;;  %v382_v24 = vadd.f32 %v1413_v17, %v381_v23  ;;  %v1614_v21 = vld [vmem:[#allocation8 + $0x8] sm:$0xff]   ;;  %v1615_v23 = vld [vmem:[#allocation8] sm:$0xff]  }
 0x118   :  { %v1519_v25 = vpop.f32.mrf.mxu0 }
 0x119   :  { %v2042_v26 = vadd.f32 %v414_v22, %v1900_v13  ;;  %v412_v27 = vmax.f32 %v382_v24, 0.0  ;;  %v393_v28 = vadd.f32 %v1519_v25, %v1413_v17 }
 0x11a   :  { %v384_v29 = vpop.f32.mrf.mxu0 }
 0x11b   :  { %v2045_v30 = vadd.f32 %v412_v27, %v1878_v7  ;;  %v415_v32 = vmax.f32 %v393_v28, 0.0  ;;  %v385_v33 = vadd.f32 %v1413_v17, %v384_v29  ;;  %432 = vadd.xlane.f32.xlu1 %v2042_v26  ;;  %v446_v35 = vmul.f32 %v2042_v26, %v2042_v26 }
 0x11d   :  { %v413_v34 = vmax.f32 %v385_v33, 0.0  ;;  %428 = vadd.xlane.f32.xlu0 %v2045_v30  ;;  %v2052_v36 = vadd.f32 %v415_v32, %v1890_v9  ;;  %v444_v42 = vmul.f32 %v2045_v30, %v2045_v30 }
 0x11f   :  { %v1522_v13 = vpop.f32.mrf.mxu0  ;;  %456 = vadd.xlane.f32.xlu1 %v446_v35  ;;  %v2055_v38 = vadd.f32 %v413_v34, %v1883_v8  ;;  %v447_v9 = vmul.f32 %v2052_v36, %v2052_v36 }
 0x120   :  { %v406_v37 = vadd.f32 %v1522_v13, %v1413_v17 }
 0x121   :  { %v397_v7 = vpop.f32.mrf.mxu0  ;;  %434 = vadd.xlane.f32.xlu0 %v2052_v36  ;;  %v445_v14 = vmul.f32 %v2055_v38, %v2055_v38 }
 0x122   :  { %v418_v39 = vmax.f32 %v406_v37, 0.0  ;;  %v398_v41 = vadd.f32 %v1413_v17, %v397_v7 }
 0x123   :  { %430 = vadd.xlane.f32.xlu1 %v2055_v38  ;;  %v1523_v11 = vpop.f32.mrf.mxu0 }
 0x124   :  { %v2064_v43 = vadd.f32 %v418_v39, %v1991_v20  ;;  %v416_v8 = vmax.f32 %v398_v41, 0.0  ;;  %v409_v46 = vadd.f32 %v1523_v11, %v1413_v17 }
 0x125   :  { %452 = vadd.xlane.f32.xlu0 %v444_v42  ;;  %v400_v31 = vpop.f32.mrf.mxu0 }
 0x126   :  { %v2069_v47 = vadd.f32 %v416_v8, %v1952_v45  ;;  %v401_v48 = vadd.f32 %v1413_v17, %v400_v31  ;;  %v419_v49 = vmax.f32 %v409_v46, 0.0  ;;  %v450_v20 = vmul.f32 %v2064_v43, %v2064_v43  ;;  %v1612_v17 = vld [vmem:[#allocation8 + $0x18] sm:$0xff]  }
 0x127   :  { %458 = vadd.xlane.f32.xlu1 %v447_v9  ;;  %1532 = vmatprep.subr.bf16.mxu1 %v1612_v17 }
 0x128   :  { %v417_v50 = vmax.f32 %v401_v48, 0.0  ;;  %v448_v53 = vmul.f32 %v2069_v47, %v2069_v47  ;;  %v2078_v44 = vadd.f32 %v419_v49, %v1968_v52  ;;  %v113_v52 = vld [vmem:[%s2798_s1 + $0x18] sm:$0xff]  ;;  %1533 = vmatpush3.bf16.msra.mxu1 %v1612_v17  ;;  %v2165_v17 = vld [vmem:[%s2804_s7 + $0x3] sm:$0x1] }
 0x129   :  { %454 = vadd.xlane.f32.xlu0 %v445_v14  ;;  %vm121_vm2 = vcmp.gt.f32.partialorder %v113_v52, 0.5  ;;  %1534 = vmatprep.subr.bf16.mxu1 %v1613_v19 }
 0x12a   :  { %v2081_v45 = vadd.f32 %v417_v50, %v1963_v51  ;;  %v451_v54 = vmul.f32 %v2078_v44, %v2078_v44  ;;  %v111_v51 = vld [vmem:[%s2798_s1 + $0x8] sm:$0xff]  ;;  %v571_v56 = vsel %vm121_vm2, 1, %v1770_v18 }
 0x12b   :  { %440 = vadd.xlane.f32.xlu1 %v2064_v43  ;;  %vm119_vm3 = vcmp.gt.f32.partialorder %v111_v51, 0.5 }
 0x12c   :  { %v449_v55 = vmul.f32 %v2081_v45, %v2081_v45  ;;  %v569_v58 = vsel %vm119_vm3, 1, %v1770_v18  ;;  %1535 = vmatpush3.bf16.msra.mxu1 %v1613_v19  ;;  %v2816_v19 = vrot.slane %v2148_v1, 4 }
 0x12d   :  { %436 = vadd.xlane.f32.xlu0 %v2069_v47  ;;  %1536 = vmatprep.subr.bf16.mxu1 %v1614_v21 }
 0x12f   :  { %464 = vadd.xlane.f32.xlu1 %v450_v20 }
 0x130   :  { %1537 = vmatpush3.bf16.msra.mxu1 %v1614_v21 }
 0x131   :  { %460 = vadd.xlane.f32.xlu0 %v448_v53  ;;  %1538 = vmatprep.subr.bf16.mxu1 %v1615_v23 }
 0x133   :  { %442 = vadd.xlane.f32.xlu1 %v2078_v44 }
 0x134   :  { %1539 = vmatpush3.bf16.msra.mxu1 %v1615_v23  ;;  %v2814_v23 = vrot.slane %v2158_v4, 2 }
 0x135   :  { %438 = vadd.xlane.f32.xlu0 %v2081_v45 }
 0x137   :  { %466 = vadd.xlane.f32.xlu1 %v451_v54 }
 0x139   :  { %462 = vadd.xlane.f32.xlu0 %v449_v55 }
 0x148   :  { %586 = vperm.xlu1 %1599, %v571_v56  }
 0x14c   :  { %580 = vperm.xlu1 %1599, %v569_v58  }
 0x14f   :  { %577 = vperm.xlu0 %1598, %v568_v61  }
 0x150   :  { %583 = vperm.xlu1 %1599, %v570_v62  }
 0x154   :  { %589 = vperm.xlu1 %1599, %v572_v0  }
 0x158   :  { %598 = vperm.xlu1 %1599, %v575_v2   ;;  %v2153_v2 = vld [vmem:[%s2804_s7 + $0x1] sm:$0x1] }
 0x159   :  { %v2815_v21 = vrot.slane %v2153_v2, 3 }
 0x15c   :  { %592 = vperm.xlu1 %1599, %v573_v6  }
 0x160   :  { %595 = vperm.xlu1 %1599, %v574_v12  }
 0x1a4   :  { %v433_v18 = vpop.xlane.xlu1 %432 }
 0x1a5   :  { %v2121_v22 = vmul.f32 0.0078125, %v433_v18  ;;  %v2812_v18 = vrot.slane %v2148_v1, 3 }
 0x1a6   :  { %v429_v24 = vpop.xlane.xlu0 %428 }
 0x1a7   :  { %v486_v27 = vmul.f32 %v2121_v22, %v2121_v22  ;;  %v2125_v32 = vmul.f32 0.0078125, %v429_v24 }
 0x1a8   :  { %v457_v25 = vpop.xlane.xlu1 %456 }
 0x1a9   :  { %v478_v28 = vmul.f32 0.0078125, %v457_v25  ;;  %v484_v7 = vmul.f32 %v2125_v32, %v2125_v32 }
 0x1aa   :  { %v435_v29 = vpop.xlane.xlu0 %434 }
 0x1ab   :  { %v494_v33 = vsub.f32 %v478_v28, %v486_v27  ;;  %v2127_v13 = vmul.f32 0.0078125, %v435_v29  ;;  %v2813_v27 = vrot.slane %v2153_v2, 2  ;;  %v2176_v28 = vrot.slane %v2158_v4, %v1873_v5 }
 0x1ac   :  { %v431_v34 = vpop.xlane.xlu1 %430 }
 0x1ad   :  { %v502_v35 = vmax.f32 %v494_v33, 0.0  ;;  %v2131_v39 = vmul.f32 0.0078125, %v431_v34  ;;  %v487_v9 = vmul.f32 %v2127_v13, %v2127_v13 }
 0x1ae   :  { %v453_v37 = vpop.xlane.xlu0 %452 }
 0x1af   :  { %v476_v41 = vmul.f32 0.0078125, %v453_v37  ;;  %v518_v42 = vadd.f32 1e-05, %v502_v35  ;;  %v485_v46 = vmul.f32 %v2131_v39, %v2131_v39 }
 0x1b0   :  { %v459_v11 = vpop.xlane.xlu1 %458 }
 0x1b1   :  { %v492_v8 = vsub.f32 %v476_v41, %v484_v7  ;;  %v479_v14 = vmul.f32 0.0078125, %v459_v11  ;;  %1624 = vrsqrt.f32 %v518_v42  ;;  %v510_v41 = vsub.f32 %v2042_v26, %v2121_v22 }
 0x1b2   :  { %v455_v31 = vpop.xlane.xlu0 %454 }
 0x1b3   :  { %v500_v48 = vmax.f32 %v492_v8, 0.0  ;;  %v495_v49 = vsub.f32 %v479_v14, %v487_v9  ;;  %v477_v20 = vmul.f32 0.0078125, %v455_v31  ;;  %v2187_v8 = vrot.slane %v2148_v1, %v1873_v5 }
 0x1b4   :  { %v441_v50 = vpop.xlane.xlu1 %440  ;;  %v508_v14 = vsub.f32 %v2045_v30, %v2125_v32  ;;  %v2204_v30 = vrot.slane %v2165_v17, %v1873_v5 }
 0x1b5   :  { %v516_v53 = vadd.f32 1e-05, %v500_v48  ;;  %v503_v54 = vmax.f32 %v495_v49, 0.0  ;;  %v493_v55 = vsub.f32 %v477_v20, %v485_v46  ;;  %v2137_v10 = vmul.f32 0.0078125, %v441_v50  ;;  %v2196_v49 = vld [vmem:[%s2804_s7 + $0x4] sm:$0x1] }
 0x1b6   :  { %v437_v52 = vpop.xlane.xlu0 %436  ;;  %v2200_v50 = vrot.slane %v2153_v2, %v1873_v5  ;;  %v2208_v32 = vrot.slane %v2196_v49, %v1873_v5 }
 0x1b7   :  { %1626 = vrsqrt.f32 %v516_v53  ;;  %v519_v51 = vadd.f32 1e-05, %v503_v54  ;;  %v501_v56 = vmax.f32 %v493_v55, 0.0  ;;  %v2139_v40 = vmul.f32 0.0078125, %v437_v52  ;;  %v2215_v52 = vld [vmem:[%s2802_s5] ss:$0 sm:$0xff] }
 0x1b8   :  { %v465_v57 = vpop.xlane.xlu1 %464  ;;  %v490_v62 = vmul.f32 %v2137_v10, %v2137_v10  ;;  %v511_v53 = vsub.f32 %v2052_v36, %v2127_v13 }
 0x1b9   :  { %1628 = vrsqrt.f32 %v519_v51  ;;  %v517_v58 = vadd.f32 1e-05, %v501_v56  ;;  %v482_v59 = vmul.f32 0.0078125, %v465_v57  ;;  %v488_v63 = vmul.f32 %v2139_v40, %v2139_v40 }
 0x1ba   :  { %v461_v60 = vpop.xlane.xlu0 %460  ;;  %v509_v57 = vsub.f32 %v2055_v38, %v2131_v39 }
 0x1bb   :  { %1630 = vrsqrt.f32 %v517_v58  ;;  %v480_v61 = vmul.f32 0.0078125, %v461_v60  ;;  %v498_v12 = vsub.f32 %v482_v59, %v490_v62 }
 0x1bc   :  { %v443_v0 = vpop.xlane.xlu1 %442 }
 0x1bd   :  { %v2160_v6 = vmul.f32 0.0078125, %v443_v0  ;;  %v496_v15 = vsub.f32 %v480_v61, %v488_v63  ;;  %v506_v42 = vmax.f32 %v498_v12, 0.0 }
 0x1be   :  { %v439_v16 = vpop.xlane.xlu0 %438  ;;  %v1625_v33 = vpop.eup %1624 }
 0x1bf   :  { %v2171_v24 = vmul.f32 0.0078125, %v439_v16  ;;  %v491_v34 = vmul.f32 %v2160_v6, %v2160_v6  ;;  %v504_v11 = vmax.f32 %v496_v15, 0.0  ;;  %v534_v20 = vmul.f32 %v1625_v33, %v510_v41  ;;  %v2230_v16 = vld [vmem:[%s2803_s6] ss:$0 sm:$0xff] }
 0x1c0   :  { %v467_v25 = vpop.xlane.xlu1 %466  ;;  %v522_v58 = vadd.f32 1e-05, %v506_v42 }
 0x1c1   :  { %v483_v35 = vmul.f32 0.0078125, %v467_v25  ;;  %v489_v31 = vmul.f32 %v2171_v24, %v2171_v24  ;;  %v520_v59 = vadd.f32 1e-05, %v504_v11  ;;  %v548_v12 = vmul.f32 %v2215_v52, %v534_v20 }
 0x1c2   :  { %v463_v9 = vpop.xlane.xlu0 %462  ;;  %1632 = vrsqrt.f32 %v522_v58 }
 0x1c3   :  { %v499_v46 = vsub.f32 %v483_v35, %v491_v34  ;;  %v481_v48 = vmul.f32 0.0078125, %v463_v9  ;;  %1634 = vrsqrt.f32 %v520_v59 }
 0x1c4   :  { %v1627_v26 = vpop.eup %1626  ;;  %v587_v22 = vpop.permute.xlu1 %586 }
 0x1c5   :  { %v507_v54 = vmax.f32 %v499_v46, 0.0  ;;  %v497_v55 = vsub.f32 %v481_v48, %v489_v31  ;;  %v532_v51 = vmul.f32 %v1627_v26, %v508_v14  ;;  %vm603_vm10 = vcmp.eq.s32.totalorder %v587_v22, 1 }
 0x1c6   :  { %v1629_v56 = vpop.eup %1628  ;;  %vm2236_vm11 = vmneg %vm603_vm10  ;;  %v562_v26 = vadd.f32 %v2230_v16, %v548_v12 }
 0x1c7   :  { %v505_v60 = vmax.f32 %v497_v55, 0.0  ;;  %v535_v61 = vmul.f32 %v1629_v56, %v511_v53  ;;  %v546_v36 = vmul.f32 %v2215_v52, %v532_v51  ;;  %v523_v63 = vadd.f32 1e-05, %v507_v54 }
 0x1c8   :  { %v1631_v13 = vpop.eup %1630  ;;  %v581_v0 = vpop.permute.xlu1 %580 }
 0x1c9   :  { %v521_v39 = vadd.f32 1e-05, %v505_v60  ;;  %v549_v25 = vmul.f32 %v2215_v52, %v535_v61  ;;  %v533_v33 = vmul.f32 %v1631_v13, %v509_v57  ;;  %vm601_vm12 = vcmp.eq.s32.totalorder %v581_v0, 1 }
 0x1ca   :  { %v560_v41 = vadd.f32 %v2230_v16, %v546_v36  ;;  %v578_v42 = vpop.permute.xlu0 %577  ;;  %vm2245_vm14 = vmneg %vm601_vm12  ;;  %1636 = vrsqrt.f32 %v523_v63  ;;  %v2833_v57 = vmov 0 }
 0x1cb   :  { %v563_v11 = vadd.f32 %v2230_v16, %v549_v25  ;;  %v547_v9 = vmul.f32 %v2215_v52, %v533_v33  ;;  %vm600_vm15 = vcmp.eq.s32.totalorder %v578_v42, 1  ;;  %1638 = vrsqrt.f32 %v521_v39 }
 0x1cc   :  { %v2251_v46 = vsel %vm600_vm15, 0.0, %v560_v41  ;;  %vm2253_vm2 = vmneg %vm600_vm15  ;;  %v584_v20 = vpop.permute.xlu1 %583 }
 0x1cd   :  { %v2259_v53 = vsel %vm603_vm10, 0.0, %v563_v11  ;;  %v561_v54 = vadd.f32 %v2230_v16, %v547_v9  ;;  %vm602_vm4 = vcmp.eq.s32.totalorder %v584_v20, 1  ;;  %v644_v61 = vmul.f32 %v2176_v28, %v2251_v46 }
 0x1ce   :  { %v2269_v55 = vmul.f32 %v2816_v19, %v2259_v53  ;;  %v2274_v51 = vmul.f32 %v2815_v21, %v2259_v53  ;;  %v2279_v22 = vmul.f32 %v2814_v23, %v2259_v53  ;;  %v2284_v56 = vmul.f32 %v2812_v18, %v2259_v53  ;;  %vm2286_vm5 = vmneg %vm602_vm4 }
 0x1cf   :  { %v2834_v57 = vsel %vm2286_vm5, 4294967295, %v2833_v57  ;;  %v2293_v58 = vmul.f32 %v2813_v27, %v2259_v53  ;;  %v2296_v59 = vsel %vm601_vm12, 0.0, %v561_v54  ;;  %v2298_v60 = vsel %vm602_vm4, 0.0, %v562_v26 }
 0x1d0   :  { %2835 = vst [vmem:[#allocation16_spill] sm:$0xff] %v2834_v57  ;;  %v645_v63 = vmul.f32 %v2176_v28, %v2296_v59  ;;  %v649_v0 = vrot.slane %v2296_v59, 6  ;;  %v2311_v12 = vpop.permute.xlu1 %589  ;;  %v670_v25 = vrot.slane %v2296_v59, 7  ;;  %v690_v33 = vrot.slane %v2296_v59, 1 }
 0x1d1   :  { %v646_v42 = vmul.f32 %v2176_v28, %v2298_v60  ;;  %v647_v11 = vmul.f32 %v2176_v28, %v2259_v53  ;;  %v648_v9 = vrot.slane %v2251_v46, 6  ;;  %v650_v26 = vrot.slane %v2298_v60, 6 }
 0x1d2   :  { %v651_v20 = vrot.slane %v2259_v53, 6  ;;  %v669_v54 = vrot.slane %v2251_v46, 7  ;;  %v671_v18 = vrot.slane %v2298_v60, 7  ;;  %v672_v27 = vrot.slane %v2259_v53, 7 }
 0x1d3   :  { %v654_v23 = vsel %vm652_vm13, %v649_v0, %v650_v26  ;;  %v655_v21 = vsel %vm652_vm13, %v648_v9, %v649_v0  ;;  %v689_v19 = vrot.slane %v2251_v46, 1  ;;  %v691_v15 = vrot.slane %v2298_v60, 1 }
 0x1d4   :  { %v653_v5 = vsel %vm652_vm13, %v650_v26, %v651_v20  ;;  %v656_v29 = vsel %vm652_vm13, %v651_v20, %v648_v9  ;;  %v662_v62 = vmul.f32 %v2187_v8, %v655_v21  ;;  %v663_v31 = vmul.f32 %v2187_v8, %v654_v23  ;;  %v2346_v39 = vpop.permute.xlu1 %598  ;;  %v2348_v26 = vpop.eup %1632 }
 0x1d5   :  { %v661_v34 = vmul.f32 %v2187_v8, %v656_v29  ;;  %v664_v38 = vmul.f32 %v2187_v8, %v653_v5  ;;  %v673_v0 = vsel %vm162_vm0, %v671_v18, %v672_v27  ;;  %v674_v7 = vsel %vm162_vm0, %v670_v25, %v671_v18  ;;  %v1635_v29 = vpop.eup %1634 }
 0x1d6   :  { %v666_v13 = vadd.f32 %v662_v62, %v645_v63  ;;  %v667_v9 = vadd.f32 %v663_v31, %v646_v42  ;;  %v675_v21 = vsel %vm162_vm0, %v669_v54, %v670_v25  ;;  %v676_v23 = vsel %vm162_vm0, %v672_v27, %v669_v54 }
 0x1d7   :  { %v665_v5 = vadd.f32 %v661_v34, %v644_v61  ;;  %v668_v20 = vadd.f32 %v664_v38, %v647_v11  ;;  %v681_v41 = vmul.f32 %v2200_v50, %v676_v23  ;;  %v682_v37 = vmul.f32 %v2200_v50, %v675_v21  ;;  %v1637_v18 = vpop.eup %1636 }
 0x1d8   :  { %v683_v36 = vmul.f32 %v2200_v50, %v674_v7  ;;  %v684_v57 = vmul.f32 %v2200_v50, %v673_v0  ;;  %v692_v62 = vrot.slane %v2259_v53, 1  ;;  %v694_v31 = vsel %vm183_vm1, %v690_v33, %v691_v15  ;;  %v1639_v63 = vpop.eup %1638 }
 0x1d9   :  { %v685_v25 = vadd.f32 %v681_v41, %v665_v5  ;;  %v686_v27 = vadd.f32 %v682_v37, %v666_v13  ;;  %v695_v38 = vsel %vm183_vm1, %v689_v19, %v690_v33  ;;  %v702_v34 = vmul.f32 %v2204_v30, %v694_v31  ;;  %v2371_v13 = vpop.permute.xlu1 %592 }
 0x1da   :  { %v687_v61 = vadd.f32 %v683_v36, %v667_v9  ;;  %v688_v42 = vadd.f32 %v684_v57, %v668_v20  ;;  %v693_v7 = vsel %vm183_vm1, %v691_v15, %v692_v62  ;;  %v696_v11 = vsel %vm183_vm1, %v692_v62, %v689_v19 }
 0x1db   :  { %v701_v54 = vmul.f32 %v2204_v30, %v695_v38  ;;  %v703_v0 = vmul.f32 %v2204_v30, %v693_v7  ;;  %v704_v41 = vmul.f32 %v2204_v30, %v696_v11  ;;  %v706_v37 = vadd.f32 %v702_v34, %v686_v27 }
 0x1dc   :  { %v709_v33 = vrot.slane %v2251_v46, 2  ;;  %v711_v36 = vrot.slane %v2298_v60, 2  ;;  %v712_v57 = vrot.slane %v2259_v53, 2  ;;  %v2836_v15 = vrot.slane %v2274_v51, 1 }
 0x1dd   :  { %v705_v19 = vadd.f32 %v701_v54, %v685_v25  ;;  %v707_v21 = vadd.f32 %v703_v0, %v687_v61  ;;  %v708_v23 = vadd.f32 %v704_v41, %v688_v42  ;;  %v2837_v5 = vrot.slane %v2165_v17, 1 }
 0x1de   :  { %v787_v9 = vadd.f32 %v2836_v15, %v2269_v55  ;;  %v714_v62 = vsel %vm2818_vm7, %v711_v36, %v712_v57  ;;  %v2838_v31 = vrot.slane %v2296_v59, 2  ;;  %v717_v51 = vsel %vm2818_vm7, %v712_v57, %v709_v33 }
 0x1df   :  { %v797_v20 = vmul.f32 %v2837_v5, %v2259_v53  ;;  %v724_v61 = vmul.f32 %v2208_v32, %v714_v62  ;;  %v725_v42 = vmul.f32 %v2208_v32, %v717_v51  ;;  %v2840_v7 = vrot.slane %v2279_v22, 2 }
 0x1e0   :  { %v715_v27 = vsel %vm2818_vm7, %v2838_v31, %v711_v36  ;;  %v2839_v38 = vmov %v2838_v31  ;;  %v2841_v0 = vrot.slane %v2293_v58, 1  ;;  %v2842_v36 = vrot.slane %v2158_v4, 1  ;;  %v2410_v31 = vpop.permute.xlu1 %595 }
 0x1e1   :  { %v716_v55 = vsel %vm2818_vm7, %v709_v33, %v2839_v38  ;;  %v723_v34 = vmul.f32 %v2208_v32, %v715_v27  ;;  %v794_v11 = vadd.f32 %v2840_v7, %v787_v9  ;;  %v799_v54 = vrot.slane %v797_v20, 3 }
 0x1e2   :  { %v722_v25 = vmul.f32 %v2208_v32, %v716_v55  ;;  %v812_v41 = vadd.f32 %v2841_v0, %v2284_v56  ;;  %v815_v33 = vmul.f32 %v2842_v36, %v2259_v53  ;;  %v2408_v5 = vadd.f32 %v724_v61, %v707_v21 }
 0x1e3   :  { %v2406_v15 = vadd.f32 %v723_v34, %v706_v37  ;;  %v729_v62 = vadd.f32 %v725_v42, %v708_v23  ;;  %v801_v27 = vadd.f32 %v799_v54, %v794_v11  ;;  %v2843_v9 = vsub.f32 %v2069_v47, %v2139_v40 }
 0x1e4   :  { %v726_v57 = vadd.f32 %v722_v25, %v705_v19  ;;  %v817_v22 = vrot.slane %v815_v33, 2  ;;  %vm604_vm8 = vcmp.eq.s32.totalorder %v2311_v12, 1  ;;  %v2846_v58 = vsub.f32 %v2078_v44, %v2160_v6 }
 0x1e5   :  { %v536_v20 = vmul.f32 %v1635_v29, %v2843_v9  ;;  %733 = vst [vmem:[#allocation2 + $0x18] sm:$0xff] %v729_v62  ;;  %vm2418_vm9 = vmneg %vm604_vm8  ;;  %vm607_vm10 = vcmp.eq.s32.totalorder %v2346_v39, 1  ;;  %v2847_v47 = vsub.f32 %v2081_v45, %v2171_v24  ;;  %vm605_vm12 = vcmp.eq.s32.totalorder %v2371_v13, 1 }
 0x1e6   :  { %730 = vst [vmem:[#allocation2] sm:$0xff] %v726_v57  ;;  %v539_v37 = vmul.f32 %v1637_v18, %v2846_v58  ;;  %802 = vst [vmem:[#allocation2 + $0x1a] sm:$0x10] %v801_v27  ;;  %v819_v29 = vadd.f32 %v817_v22, %v812_v41  ;;  %v2850_v44 = vsub.f32 %v2064_v43, %v2137_v10  ;;  %vm606_vm4 = vcmp.eq.s32.totalorder %v2410_v31, 1 }
 0x1e7   :  { %v537_v40 = vmul.f32 %v1639_v63, %v2847_v47  ;;  %v550_v19 = vmul.f32 %v2215_v52, %v536_v20  ;;  %vm2433_vm15 = vmneg %vm607_vm10  ;;  %v2851_v45 = vrot.slane %v2158_v4, 7  ;;  %v2854_v43 = vrot.slane %v2165_v17, 7 }
 0x1e8   :  { %v538_v6 = vmul.f32 %v2348_v26, %v2850_v44  ;;  %v553_v18 = vmul.f32 %v2215_v52, %v539_v37  ;;  %vm2451_vm6 = vmneg %vm605_vm12  ;;  %820 = vst [vmem:[#allocation2 + $0x1a] sm:$0x20] %v819_v29  ;;  %v761_v38 = vrot.slane %v2165_v17, 6  ;;  %v2855_v51 = vrot.slane %v2196_v49, 6 }
 0x1e9   :  { %v2445_v24 = vmul.f32 %v2851_v45, %v2251_v46  ;;  %v551_v63 = vmul.f32 %v2215_v52, %v537_v40  ;;  %v2458_v10 = vmul.f32 %v2854_v43, %v2251_v46  ;;  %v564_v26 = vadd.f32 %v2230_v16, %v550_v19  ;;  %vm2477_vm7 = vmneg %vm606_vm4 }
 0x1ea   :  { %v552_v55 = vmul.f32 %v2215_v52, %v538_v6  ;;  %v2470_v25 = vmul.f32 %v2855_v51, %v2251_v46  ;;  %v567_v34 = vadd.f32 %v2230_v16, %v553_v18  ;;  %v768_v61 = vrot.slane %v2196_v49, 5  ;;  %vm1461_vm3 = vmpackc.low %vm2433_vm15, %vm2477_vm7 }
 0x1eb   :  { %v565_v42 = vadd.f32 %v2230_v16, %v551_v63  ;;  %v2856_v7 = vmov 0  ;;  %v2483_v52 = vsel %vm604_vm8, 0.0, %v564_v26  ;;  %v2491_v11 = vmul.f32 %v2158_v4, %v2251_v46 }
 0x1ec   :  { %v2857_v7 = vsel %vm2477_vm7, 4294967295, %v2856_v7  ;;  %v2496_v0 = vmul.f32 %v2153_v2, %v2251_v46  ;;  %v2500_v12 = vsel %vm607_vm10, 0.0, %v567_v34  ;;  %v566_v36 = vadd.f32 %v2230_v16, %v552_v55 }
 0x1ed   :  { %2858 = vst [vmem:[#allocation17_spill] sm:$0xff] %v2857_v7  ;;  %v2504_v41 = vsel %vm605_vm12, 0.0, %v565_v42  ;;  %v821_v57 = vmul.f32 %v2176_v28, %v2483_v52  ;;  %v825_v62 = vrot.slane %v2483_v52, 6  ;;  %v2513_v22 = vmul.f32 %v761_v38, %v2251_v46  ;;  %vm2885_vm12 = vmpackc.low %vm2236_vm11, %vm2286_vm5 }
 0x1ee   :  { %v2859_v39 = vrot.slane %v2148_v1, 4  ;;  %v2860_v9 = vrot.slane %v2153_v2, 3  ;;  %v2825_v20 = vrot.slane %v2500_v12, 6  ;;  %v2823_v58 = vrot.slane %v2500_v12, 7  ;;  %vm2886_vm11 = vmpackc.low %vm2451_vm6, %vm2418_vm9 }
 0x1ef   :  { %v2861_v37 = vrot.slane %v2158_v4, 2  ;;  %v2862_v40 = vrot.slane %v2153_v2, 2  ;;  %v2824_v19 = vrot.slane %v2504_v41, 6  ;;  %v841_v44 = vrot.slane %v2483_v52, 7 }
 0x1f0   :  { %v922_v13 = vmul.f32 %v2859_v39, %v2500_v12  ;;  %v923_v16 = vmul.f32 %v2860_v9, %v2500_v12  ;;  %v822_v6 = vmul.f32 %v2176_v28, %v2504_v41  ;;  %v832_v45 = vsel %vm652_vm13, %v2825_v20, %v825_v62 }
 0x1f1   :  { %v2526_v47 = vmul.f32 %v2861_v37, %v2500_v12  ;;  %v940_v29 = vmul.f32 %v2862_v40, %v2500_v12  ;;  %v2822_v18 = vrot.slane %v2504_v41, 7  ;;  %v857_v63 = vrot.slane %v2483_v52, 1 }
 0x1f2   :  { %v831_v43 = vsel %vm652_vm13, %v825_v62, %v2824_v19  ;;  %v833_v26 = vmul.f32 %v832_v45, %v2187_v8  ;;  %v848_v55 = vsel %vm162_vm0, %v2823_v58, %v841_v44  ;;  %v2821_v51 = vrot.slane %v2504_v41, 1 }
 0x1f3   :  { %v925_v34 = vrot.slane %v923_v16, 1  ;;  %v834_v42 = vmul.f32 %v831_v43, %v2187_v8  ;;  %v847_v39 = vsel %vm162_vm0, %v841_v44, %v2822_v18  ;;  %v849_v9 = vmul.f32 %v848_v55, %v2200_v50 }
 0x1f4   :  { %v837_v62 = vadd.f32 %v833_v26, %v821_v57  ;;  %v863_v37 = vsel %vm183_vm1, %v857_v63, %v2821_v51  ;;  %v2819_v40 = vrot.slane %v2483_v52, 2  ;;  %v2820_v45 = vrot.slane %v2504_v41, 2 }
 0x1f5   :  { %v942_v16 = vrot.slane %v940_v29, 1  ;;  %v838_v33 = vadd.f32 %v834_v42, %v822_v6  ;;  %v850_v43 = vmul.f32 %v847_v39, %v2200_v50  ;;  %v2863_v27 = vrot.slane %v2165_v17, 7 }
 0x1f6   :  { %v853_v54 = vadd.f32 %v849_v9, %v837_v62  ;;  %v865_v57 = vmul.f32 %v863_v37, %v2204_v30  ;;  %vm2864_vm8 = vcmp.lt.s32.totalorder %v1870_v3, 6  ;;  %v2865_v29 = vrot.slane %v2196_v49, 6 }
 0x1f7   :  { %v894_v44 = vmul.f32 %v2863_v27, %v2483_v52  ;;  %v879_v26 = vsel %vm2864_vm8, %v2819_v40, %v2820_v45  ;;  %v893_v55 = vmul.f32 %v2158_v4, %v2483_v52  ;;  %v905_v27 = vmul.f32 %v2153_v2, %v2483_v52 }
 0x1f8   :  { %v899_v6 = vmul.f32 %v2865_v29, %v2483_v52  ;;  %v2866_v39 = vrot.slane %v2158_v4, 7  ;;  %v869_v62 = vadd.f32 %v865_v57, %v853_v54  ;;  %v881_v37 = vmul.f32 %v879_v26, %v2208_v32 }
 0x1f9   :  { %v896_v42 = vrot.slane %v894_v44, 1  ;;  %v911_v40 = vmul.f32 %v761_v38, %v2483_v52  ;;  %v916_v29 = vmul.f32 %v768_v61, %v2483_v52  ;;  %v860_v44 = vrot.slane %v2500_v12, 1 }
 0x1fa   :  { %v906_v9 = vmul.f32 %v2866_v39, %v2483_v52  ;;  %v901_v51 = vrot.slane %v899_v6, 2  ;;  %v930_v2 = vrot.slane %v2526_v47, 2  ;;  %v2867_v58 = vrot.slane %v2148_v1, 3 }
 0x1fb   :  { %v898_v45 = vadd.f32 %v896_v42, %v893_v55  ;;  %v854_v54 = vadd.f32 %v850_v43, %v838_v33  ;;  %v885_v57 = vadd.f32 %v881_v37, %v869_v62  ;;  %v913_v38 = vrot.slane %v911_v40, 2 }
 0x1fc   :  { %v908_v18 = vrot.slane %v906_v9, 1  ;;  %v939_v39 = vmul.f32 %v2867_v58, %v2500_v12  ;;  %v927_v20 = vadd.f32 %v925_v34, %v922_v13  ;;  %v918_v7 = vrot.slane %v916_v29, 3 }
 0x1fd   :  { %v903_v26 = vadd.f32 %v901_v51, %v898_v45  ;;  %889 = vst [vmem:[#allocation2 + $0x20] sm:$0xff] %v885_v57  ;;  %v824_v6 = vmul.f32 %v2176_v28, %v2500_v12  ;;  %v876_v55 = vrot.slane %v2500_v12, 2  ;;  %v2599_v47 = vsel %vm606_vm4, 0.0, %v566_v36 }
 0x1fe   :  { %v910_v19 = vadd.f32 %v908_v18, %v905_v27  ;;  %v2868_v33 = vrot.slane %v2165_v17, 1  ;;  %v944_v18 = vadd.f32 %v942_v16, %v939_v39  ;;  %v864_v13 = vsel %vm183_vm1, %v860_v44, %v857_v63 }
 0x1ff   :  { %904 = vst [vmem:[#allocation2 + $0x20] sm:$0x1] %v903_v26  ;;  %v2869_v51 = vrot.slane %v2158_v4, 1  ;;  %v827_v40 = vrot.slane %v2599_v47, 6  ;;  %v843_v31 = vrot.slane %v2599_v47, 7  ;;  %v859_v36 = vrot.slane %v2599_v47, 1 }
 0x200   :  { %v915_v1 = vadd.f32 %v913_v38, %v910_v19  ;;  %v933_v58 = vmul.f32 %v2868_v33, %v2500_v12  ;;  %v932_v19 = vadd.f32 %v930_v2, %v927_v20  ;;  %v823_v17 = vmul.f32 %v2176_v28, %v2599_v47 }
 0x201   :  { %v945_v34 = vmul.f32 %v2869_v51, %v2500_v12  ;;  %v875_v16 = vrot.slane %v2599_v47, 2  ;;  %v2870_v43 = vrot.slane %v2500_v12, 6  ;;  %v2871_v4 = vrot.slane %v2504_v41, 6 }
 0x202   :  { %v920_v45 = vadd.f32 %v918_v7, %v915_v1  ;;  %v2872_v27 = vrot.slane %v2500_v12, 7  ;;  %v868_v20 = vmul.f32 %v864_v13, %v2204_v30  ;;  %v2873_v62 = vrot.slane %v2504_v41, 7 }
 0x203   :  { %v829_v63 = vsel %vm652_vm13, %v827_v40, %v2870_v43  ;;  %v830_v42 = vsel %vm652_vm13, %v2871_v4, %v827_v40  ;;  %v861_v39 = vsel %vm183_vm1, %v859_v36, %v860_v44  ;;  %v2874_v57 = vrot.slane %v2504_v41, 1  ;;  %vm2875_vm13 = vmmov %vm2864_vm8 }
 0x204   :  { %v845_v7 = vsel %vm162_vm0, %v843_v31, %v2872_v27  ;;  %921 = vst [vmem:[#allocation2 + $0x21] sm:$0x1] %v920_v45  ;;  %v835_v28 = vmul.f32 %v830_v42, %v2187_v8  ;;  %v836_v9 = vmul.f32 %v829_v63, %v2187_v8  ;;  %v846_v37 = vsel %vm162_vm0, %v2873_v62, %v843_v31  ;;  %vm2877_vm0 = vmmov %vm2864_vm8 }
 0x205   :  { %v852_v29 = vmul.f32 %v845_v7, %v2200_v50  ;;  %v851_v2 = vmul.f32 %v846_v37, %v2200_v50  ;;  %v862_v26 = vsel %vm183_vm1, %v2874_v57, %v859_v36  ;;  %v877_v8 = vsel %vm2875_vm13, %v875_v16, %v876_v55  ;;  %vm2879_vm10 = vmmov %vm2877_vm0 }
 0x206   :  { %v839_v38 = vadd.f32 %v835_v28, %v823_v17  ;;  %v840_v1 = vadd.f32 %v836_v9, %v824_v6  ;;  %v866_v33 = vmul.f32 %v862_v26, %v2204_v30  ;;  %v867_v13 = vmul.f32 %v861_v39, %v2204_v30  ;;  %vm2883_vm1 = vmpackc.low %vm2245_vm14, %vm2253_vm2 }
 0x207   :  { %v2876_v51 = vrot.slane %v2504_v41, 2  ;;  %v2878_v44 = vrot.slane %v2483_v52, 2  ;;  %v883_v31 = vmul.f32 %v877_v8, %v2208_v32  ;;  %v2880_v36 = vrot.slane %v2458_v10, 1 }
 0x208   :  { %v855_v45 = vadd.f32 %v851_v2, %v839_v38  ;;  %v856_v17 = vadd.f32 %v852_v29, %v840_v1  ;;  %v870_v43 = vadd.f32 %v866_v33, %v854_v54  ;;  %v2882_v3 = vrot.slane %v2445_v24, 1 }
 0x209   :  { %v878_v50 = vsel %vm2877_vm0, %v2876_v51, %v875_v16  ;;  %v880_v40 = vsel %vm2879_vm10, %v876_v55, %v2878_v44  ;;  %v742_v6 = vadd.f32 %v2880_v36, %v2491_v11  ;;  %v2881_v16 = vrot.slane %v2470_v25, 2 }
 0x20a   :  { %v882_v30 = vmul.f32 %v878_v50, %v2208_v32  ;;  %v884_v63 = vmul.f32 %v880_v40, %v2208_v32  ;;  %v760_v55 = vadd.f32 %v2882_v3, %v2496_v0  ;;  %v765_v42 = vrot.slane %v2513_v22, 2  ;;  %v954_v0 = vld [vmem:[#allocation2 + $0x18] sm:$0xff] }
 0x20b   :  { %v750_v4 = vadd.f32 %v2881_v16, %v742_v6  ;;  %v871_v27 = vadd.f32 %v867_v13, %v855_v45  ;;  %v872_v7 = vadd.f32 %v868_v20, %v856_v17  ;;  %v770_v11 = vmul.f32 %v768_v61, %v2251_v46  ;;  %v955_v22 = vld [vmem:[#allocation2 + $0x20] sm:$0xff] }
 0x20c   :  { %v886_v10 = vadd.f32 %v882_v30, %v870_v43  ;;  %v935_v54 = vrot.slane %v933_v58, 3  ;;  %v947_v28 = vrot.slane %v945_v34, 2  ;;  %v767_v32 = vadd.f32 %v765_v42, %v760_v55 }
 0x20d   :  { %751 = vst [vmem:[#allocation2] sm:$0x1] %v750_v4  ;;  %v887_v9 = vadd.f32 %v883_v31, %v871_v27  ;;  %v888_v25 = vadd.f32 %v884_v63, %v872_v7  ;;  %v772_v62 = vrot.slane %v770_v11, 3  ;;  %v960_v49 = vpack.c.bf16 %v954_v0, %v2408_v5 }
 0x20e   :  { %v937_v37 = vadd.f32 %v935_v54, %v932_v19  ;;  %v949_v29 = vadd.f32 %v947_v28, %v944_v18  ;;  %v961_v58 = vpack.c.bf16 %v886_v10, %v955_v22  ;;  %v1424_v18 = vld [vmem:[%s2806_s9] ss:$0 sm:$0xff]  ;;  %v1617_v28 = vld [vmem:[#allocation9 + $0x30] sm:$0xff]  }
 0x20f   :  { %892 = vst [vmem:[#allocation2 + $0x38] sm:$0xff] %v888_v25  ;;  %v774_v24 = vadd.f32 %v772_v62, %v767_v32  ;;  %v1616_v54 = vld [vmem:[#allocation9 + $0x38] sm:$0xff]   ;;  %v1618_v32 = vld [vmem:[#allocation9 + $0x28] sm:$0xff]   ;;  %v1621_v62 = vld [vmem:[#allocation9 + $0x10] sm:$0xff]  }
 0x210   :  { %938 = vst [vmem:[#allocation2 + $0x3a] sm:$0x10] %v937_v37  ;;  %950 = vst [vmem:[#allocation2 + $0x3a] sm:$0x20] %v949_v29  ;;  %1548 = vmatprep.subr.bf16.mxu0 %v1616_v54  ;;  %1572 = vmatprep.subr.bf16.mxu1 %v1616_v54  ;;  %v1620_v25 = vld [vmem:[#allocation9 + $0x18] sm:$0xff]   ;;  %v1622_v37 = vld [vmem:[#allocation9 + $0x8] sm:$0xff]  }
 0x211   :  { %775 = vst [vmem:[#allocation2 + $0x1] sm:$0x1] %v774_v24  ;;  %1549 = vmatpush3.bf16.msra.mxu0 %v1616_v54  ;;  %v1623_v29 = vld [vmem:[#allocation9] sm:$0xff]  }
 0x212   :  { %1550 = vmatprep.subr.bf16.mxu0 %v1617_v28 }
 0x215   :  { %1551 = vmatpush3.bf16.msra.mxu0 %v1617_v28 }
 0x216   :  { %1552 = vmatprep.subr.bf16.mxu0 %v1618_v32 }
 0x217   :  { %v958_v34 = vld [vmem:[#allocation2 + $0x38] sm:$0xff] }
 0x218   :  { %v951_v20 = vld [vmem:[#allocation2] sm:$0xff]  ;;  %v962_v2 = vpack.c.bf16 %v958_v34, %v887_v9 }
 0x219   :  { %v959_v61 = vpack.c.bf16 %v2406_v15, %v951_v20  ;;  %1553 = vmatpush3.bf16.msra.mxu0 %v1618_v32  ;;  %v1619_v9 = vld [vmem:[#allocation9 + $0x20] sm:$0xff]  }
 0x21a   :  { %1554 = vmatprep.subr.bf16.mxu0 %v1619_v9 }
 0x21b   :  { %1540 = vmatprep.mubr.bf16.mxu1 %v959_v61 }
 0x21c   :  { %1541 = vmatmul.mubr.bf16.vlgmr.msra.gmra.mxu1 %v960_v49 }
 0x21d   :  { %1544 = vmatprep.mubr.bf16.mxu1 %v961_v58  ;;  %1580 = vmatpush3.bf16.msra.mxu1 %v1616_v54 }
 0x21e   :  { %1573 = vmatprep.subr.bf16.mxu1 %v1617_v28  ;;  %1555 = vmatpush3.bf16.msra.mxu0 %v1619_v9 }
 0x21f   :  { %1556 = vmatprep.subr.bf16.mxu0 %v1620_v25 }
 0x221   :  { %1581 = vmatpush3.bf16.msra.mxu1 %v1617_v28 }
 0x222   :  { %1574 = vmatprep.subr.bf16.mxu1 %v1618_v32  ;;  %1557 = vmatpush3.bf16.msra.mxu0 %v1620_v25 }
 0x223   :  { %1558 = vmatprep.subr.bf16.mxu0 %v1621_v62 }
 0x224   :  { %1545 = vmatmul.mubr.bf16.gmra.mxu1 %v962_v2 }
 0x225   :  { %1582 = vmatpush3.bf16.msra.mxu1 %v1618_v32 }
 0x226   :  { %1575 = vmatprep.subr.bf16.mxu1 %v1619_v9  ;;  %1559 = vmatpush3.bf16.msra.mxu0 %v1621_v62 }
 0x227   :  { %1560 = vmatprep.subr.bf16.mxu0 %v1622_v37 }
 0x229   :  { %1583 = vmatpush3.bf16.msra.mxu1 %v1619_v9 }
 0x22a   :  { %1576 = vmatprep.subr.bf16.mxu1 %v1620_v25  ;;  %1561 = vmatpush3.bf16.msra.mxu0 %v1622_v37 }
 0x22b   :  { %1562 = vmatprep.subr.bf16.mxu0 %v1623_v29 }
 0x22d   :  { %1584 = vmatpush3.bf16.msra.mxu1 %v1620_v25 }
 0x22e   :  { %1577 = vmatprep.subr.bf16.mxu1 %v1621_v62  ;;  %1563 = vmatpush3.bf16.msra.mxu0 %v1623_v29 }
 0x231   :  { %1585 = vmatpush3.bf16.msra.mxu1 %v1621_v62 }
 0x232   :  { %1578 = vmatprep.subr.bf16.mxu1 %v1622_v37 }
 0x235   :  { %1586 = vmatpush3.bf16.msra.mxu1 %v1622_v37 }
 0x236   :  { %1579 = vmatprep.subr.bf16.mxu1 %v1623_v29 }
 0x239   :  { %1587 = vmatpush3.bf16.msra.mxu1 %v1623_v29 }
 0x2dc   :  { %v1542_v19 = vpop.f32.mrf.mxu1 }
 0x2dd   :  { %v1060_v39 = vadd.f32 %v1542_v19, %v1424_v18 }
 0x2de   :  { %v1051_v57 = vpop.f32.mrf.mxu1 }
 0x2df   :  { %v1084_v26 = vmax.f32 %v1060_v39, 0.0  ;;  %v1052_v8 = vadd.f32 %v1424_v18, %v1051_v57 }
 0x2e0   :  { %v1543_v38 = vpop.f32.mrf.mxu1 }
 0x2e1   :  { %v2675_v5 = vadd.f32 %v1084_v26, %v2298_v60  ;;  %v1082_v15 = vmax.f32 %v1052_v8, 0.0  ;;  %v1063_v1 = vadd.f32 %v1543_v38, %v1424_v18 }
 0x2e2   :  { %v1054_v33 = vpop.f32.mrf.mxu1 }
 0x2e3   :  { %v2678_v13 = vadd.f32 %v1082_v15, %v2251_v46  ;;  %v1085_v51 = vmax.f32 %v1063_v1, 0.0  ;;  %v1055_v50 = vadd.f32 %v1424_v18, %v1054_v33  ;;  %1102 = vadd.xlane.f32.xlu0 %v2675_v5  ;;  %v1116_v40 = vmul.f32 %v2675_v5, %v2675_v5 }
 0x2e4   :  { %v1546_v44 = vpop.f32.mrf.mxu1 }
 0x2e5   :  { %1098 = vadd.xlane.f32.xlu1 %v2678_v13  ;;  %v2685_v60 = vadd.f32 %v1085_v51, %v2259_v53  ;;  %v1083_v36 = vmax.f32 %v1055_v50, 0.0  ;;  %v1076_v6 = vadd.f32 %v1546_v44, %v1424_v18  ;;  %v1114_v46 = vmul.f32 %v2678_v13, %v2678_v13 }
 0x2e6   :  { %v1067_v31 = vpop.f32.mrf.mxu1 }
 0x2e7   :  { %1126 = vadd.xlane.f32.xlu0 %v1116_v40  ;;  %v2691_v43 = vadd.f32 %v1083_v36, %v2296_v59  ;;  %v1088_v30 = vmax.f32 %v1076_v6, 0.0  ;;  %v1117_v63 = vmul.f32 %v2685_v60, %v2685_v60  ;;  %v1068_v16 = vadd.f32 %v1424_v18, %v1067_v31 }
 0x2e8   :  { %v1547_v45 = vpop.f32.mrf.mxu1 }
 0x2e9   :  { %1104 = vadd.xlane.f32.xlu1 %v2685_v60  ;;  %v1079_v17 = vadd.f32 %v1547_v45, %v1424_v18  ;;  %v2696_v3 = vadd.f32 %v1088_v30, %v2599_v47  ;;  %v1115_v55 = vmul.f32 %v2691_v43, %v2691_v43  ;;  %v1086_v59 = vmax.f32 %v1068_v16, 0.0 }
 0x2ea   :  { %v1070_v53 = vpop.f32.mrf.mxu1 }
 0x2eb   :  { %1122 = vadd.xlane.f32.xlu0 %v1114_v46  ;;  %v1089_v4 = vmax.f32 %v1079_v17, 0.0  ;;  %v1071_v42 = vadd.f32 %v1424_v18, %v1070_v53  ;;  %v2706_v10 = vadd.f32 %v1086_v59, %v2483_v52  ;;  %v1120_v52 = vmul.f32 %v2696_v3, %v2696_v3 }
 0x2ed   :  { %1128 = vadd.xlane.f32.xlu1 %v1117_v63  ;;  %v2702_v27 = vadd.f32 %v1089_v4, %v2500_v12  ;;  %v1087_v7 = vmax.f32 %v1071_v42, 0.0  ;;  %v1118_v12 = vmul.f32 %v2706_v10, %v2706_v10 }
 0x2ef   :  { %1100 = vadd.xlane.f32.xlu0 %v2691_v43  ;;  %v2710_v47 = vadd.f32 %v1087_v7, %v2504_v41  ;;  %v1121_v41 = vmul.f32 %v2702_v27, %v2702_v27 }
 0x2f1   :  { %1124 = vadd.xlane.f32.xlu1 %v1115_v55  ;;  %v1119_v11 = vmul.f32 %v2710_v47, %v2710_v47 }
 0x2f3   :  { %1110 = vadd.xlane.f32.xlu0 %v2696_v3 }
 0x2f5   :  { %1112 = vadd.xlane.f32.xlu1 %v2702_v27 }
 0x2f7   :  { %1106 = vadd.xlane.f32.xlu0 %v2706_v10 }
 0x2f9   :  { %1108 = vadd.xlane.f32.xlu1 %v2710_v47 }
 0x2fb   :  { %1130 = vadd.xlane.f32.xlu0 %v1118_v12 }
 0x2fd   :  { %1132 = vadd.xlane.f32.xlu1 %v1119_v11 }
 0x2ff   :  { %1134 = vadd.xlane.f32.xlu0 %v1120_v52 }
 0x301   :  { %1136 = vadd.xlane.f32.xlu1 %v1121_v41 }
 0x36c   :  { %v1103_v24 = vpop.xlane.xlu0 %1102 }
 0x36d   :  { %v2722_v0 = vmul.f32 0.0078125, %v1103_v24 }
 0x36e   :  { %v1099_v22 = vpop.xlane.xlu1 %1098 }
 0x36f   :  { %v1156_v49 = vmul.f32 %v2722_v0, %v2722_v0  ;;  %v2726_v61 = vmul.f32 0.0078125, %v1099_v22 }
 0x370   :  { %v1127_v20 = vpop.xlane.xlu0 %1126 }
 0x371   :  { %v1148_v58 = vmul.f32 0.0078125, %v1127_v20  ;;  %v1154_v39 = vmul.f32 %v2726_v61, %v2726_v61 }
 0x372   :  { %v1105_v34 = vpop.xlane.xlu1 %1104 }
 0x373   :  { %v1164_v2 = vsub.f32 %v1148_v58, %v1156_v49  ;;  %v1141_v18 = vmul.f32 0.0078125, %v1105_v34 }
 0x374   :  { %v1123_v19 = vpop.xlane.xlu0 %1122 }
 0x375   :  { %v1172_v57 = vmax.f32 %v1164_v2, 0.0  ;;  %v1146_v26 = vmul.f32 0.0078125, %v1123_v19  ;;  %v1157_v38 = vmul.f32 %v1141_v18, %v1141_v18  ;;  %v1181_v49 = vsub.f32 %v2685_v60, %v1141_v18 }
 0x376   :  { %v1129_v8 = vpop.xlane.xlu1 %1128 }
 0x377   :  { %v1162_v15 = vsub.f32 %v1146_v26, %v1154_v39  ;;  %v1149_v1 = vmul.f32 0.0078125, %v1129_v8  ;;  %v1188_v51 = vadd.f32 1e-05, %v1172_v57  ;;  %v1180_v8 = vsub.f32 %v2675_v5, %v2722_v0 }
 0x378   :  { %v1101_v33 = vpop.xlane.xlu0 %1100 }
 0x379   :  { %v1170_v50 = vmax.f32 %v1162_v15, 0.0  ;;  %v1165_v44 = vsub.f32 %v1149_v1, %v1157_v38  ;;  %v2730_v40 = vmul.f32 0.0078125, %v1101_v33  ;;  %1640 = vrsqrt.f32 %v1188_v51 }
 0x37a   :  { %v1125_v31 = vpop.xlane.xlu1 %1124  ;;  %v1178_v38 = vsub.f32 %v2678_v13, %v2726_v61 }
 0x37b   :  { %v1186_v36 = vadd.f32 1e-05, %v1170_v50  ;;  %v1173_v6 = vmax.f32 %v1165_v44, 0.0  ;;  %v1155_v45 = vmul.f32 %v2730_v40, %v2730_v40  ;;  %v1147_v46 = vmul.f32 0.0078125, %v1125_v31  ;;  %v1433_v31 = vld [vmem:[%s2807_s10] ss:$0 sm:$0xff] }
 0x37c   :  { %v1111_v17 = vpop.xlane.xlu0 %1110  ;;  %v1179_v5 = vsub.f32 %v2691_v43, %v2730_v40 }
 0x37d   :  { %v1189_v30 = vadd.f32 1e-05, %v1173_v6  ;;  %1642 = vrsqrt.f32 %v1186_v36  ;;  %v1163_v63 = vsub.f32 %v1147_v46, %v1155_v45  ;;  %v2738_v11 = vmul.f32 0.0078125, %v1111_v17  ;;  %v1434_v17 = vld [vmem:[%s2808_s11] ss:$0 sm:$0xff] }
 0x37e   :  { %v1113_v53 = vpop.xlane.xlu1 %1112 }
 0x37f   :  { %1644 = vrsqrt.f32 %v1189_v30  ;;  %v1171_v16 = vmax.f32 %v1163_v63, 0.0  ;;  %v2744_v25 = vmul.f32 0.0078125, %v1113_v53  ;;  %v1160_v37 = vmul.f32 %v2738_v11, %v2738_v11 }
 0x380   :  { %v1107_v4 = vpop.xlane.xlu0 %1106 }
 0x381   :  { %v2734_v55 = vmul.f32 0.0078125, %v1107_v4  ;;  %v1187_v42 = vadd.f32 1e-05, %v1171_v16  ;;  %v1161_v15 = vmul.f32 %v2744_v25, %v2744_v25 }
 0x382   :  { %v1109_v59 = vpop.xlane.xlu1 %1108 }
 0x383   :  { %v2736_v7 = vmul.f32 0.0078125, %v1109_v59  ;;  %1646 = vrsqrt.f32 %v1187_v42  ;;  %v1158_v52 = vmul.f32 %v2734_v55, %v2734_v55  ;;  %v1182_v43 = vsub.f32 %v2706_v10, %v2734_v55 }
 0x384   :  { %v1131_v12 = vpop.xlane.xlu0 %1130  ;;  %v1184_v10 = vsub.f32 %v2696_v3, %v2738_v11 }
 0x385   :  { %v1150_v41 = vmul.f32 0.0078125, %v1131_v12  ;;  %v1159_v28 = vmul.f32 %v2736_v7, %v2736_v7  ;;  %v1183_v12 = vsub.f32 %v2710_v47, %v2736_v7 }
 0x386   :  { %v1133_v54 = vpop.xlane.xlu1 %1132  ;;  %v1641_v20 = vpop.eup %1640 }
 0x387   :  { %v1166_v32 = vsub.f32 %v1150_v41, %v1158_v52  ;;  %v1151_v9 = vmul.f32 0.0078125, %v1133_v54  ;;  %v1204_v50 = vmul.f32 %v1641_v20, %v1180_v8 }
 0x388   :  { %v1135_v62 = vpop.xlane.xlu0 %1134 }
 0x389   :  { %v1174_v29 = vmax.f32 %v1166_v32, 0.0  ;;  %v1167_v24 = vsub.f32 %v1151_v9, %v1159_v28  ;;  %v1152_v22 = vmul.f32 0.0078125, %v1135_v62  ;;  %v1218_v46 = vmul.f32 %v1433_v31, %v1204_v50 }
 0x38a   :  { %v1137_v58 = vpop.xlane.xlu1 %1136  ;;  %v1643_v34 = vpop.eup %1642  ;;  %v1185_v9 = vsub.f32 %v2702_v27, %v2744_v25  ;;  %v1435_v27 = vld [vmem:[%s2810_s13] ss:$0 sm:$0xff]  ;;  %s1399_s13 = sshll.u32 %s1771_s20, 4  ;;  %s1400_s13 = int_to_ptr.vmem [resolvable:$true] %s1399_s13 }
 0x38b   :  { %v1190_v2 = vadd.f32 1e-05, %v1174_v29  ;;  %v1175_v19 = vmax.f32 %v1167_v24, 0.0  ;;  %v1168_v39 = vsub.f32 %v1152_v22, %v1160_v37  ;;  %v1153_v57 = vmul.f32 0.0078125, %v1137_v58  ;;  %s1736_s21 = scalar_lea.vmem %s1400_s13, 1024  ;;  %p1741_p7 = scmp.lt.s32.totalorder %s1400_s13, %s1400_s13 }
 0x38c   :  { %v1645_v26 = vpop.eup %1644  ;;  %v1202_v51 = vmul.f32 %v1643_v34, %v1178_v38  ;;  %v1232_v4 = vadd.f32 %v1434_v17, %v1218_v46  ;;  %p1737_p6 = scmp.ne.s32.totalorder %s1400_s13, %s1736_s21  ;;  %p1742_p8 = scmp.lt.s32.totalorder %s1736_s21, %s1736_s21 }
 0x38d   :  { %v1205_v1 = vmul.f32 %v1645_v26, %v1181_v49  ;;  %1648 = vrsqrt.f32 %v1190_v2  ;;  %v1191_v33 = vadd.f32 1e-05, %v1175_v19  ;;  %v1176_v60 = vmax.f32 %v1168_v39, 0.0 }
 0x38e   :  { %v1169_v18 = vsub.f32 %v1153_v57, %v1161_v15  ;;  %v1216_v45 = vmul.f32 %v1433_v31, %v1202_v51  ;;  %p1743_p9 = por %p1742_p8, %p1741_p7 }
 0x38f   :  { %1650 = vrsqrt.f32 %v1191_v33  ;;  %v1192_v44 = vadd.f32 1e-05, %v1176_v60  ;;  %v1219_v61 = vmul.f32 %v1433_v31, %v1205_v1 }
 0x390   :  { %v1177_v13 = vmax.f32 %v1169_v18, 0.0  ;;  %v1647_v0 = vpop.eup %1646  ;;  %v1230_v53 = vadd.f32 %v1434_v17, %v1216_v45  ;;  %p1744_p10 = pnand %p1743_p9, %p1737_p6 }
 0x391   :  { %1652 = vrsqrt.f32 %v1192_v44  ;;  %v1203_v6 = vmul.f32 %v1647_v0, %v1179_v5  ;;  %v1233_v63 = vadd.f32 %v1434_v17, %v1219_v61 }
 0x392   :  { %v1193_v36 = vadd.f32 1e-05, %v1177_v13 }
 0x393   :  { %v1217_v30 = vmul.f32 %v1433_v31, %v1203_v6  ;;  %v1452_v40 = vpack.c.bf16 %v1233_v63, %v1232_v4 }
 0x394   :  { %1654 = vrsqrt.f32 %v1193_v36 }
 0x395   :  { %v1231_v16 = vadd.f32 %v1434_v17, %v1217_v30 }
 0x397   :  { %v1447_v42 = vpack.c.bf16 %v1231_v16, %v1230_v53 }
 0x399   :  { %1564 = vmatprep.mubr.msk.bf16.mxu0 %vm2883_vm1, %v1447_v42 }
 0x39a   :  { %v1649_v59 = vpop.eup %1648  ;;  %1565 = vmatmul.mubr.msk.bf16.vlgmr.msra.gmra.mxu0 %vm2885_vm12, %v1452_v40 }
 0x39b   :  { %v1206_v41 = vmul.f32 %v1649_v59, %v1182_v43 }
 0x39c   :  { %v1651_v54 = vpop.eup %1650 }
 0x39d   :  { %v1207_v55 = vmul.f32 %v1651_v54, %v1183_v12  ;;  %v1220_v14 = vmul.f32 %v1433_v31, %v1206_v41 }
 0x39e   :  { %v1653_v28 = vpop.eup %1652 }
 0x39f   :  { %v1208_v48 = vmul.f32 %v1653_v28, %v1184_v10  ;;  %v1221_v32 = vmul.f32 %v1433_v31, %v1207_v55  ;;  %v1234_v7 = vadd.f32 %v1434_v17, %v1220_v14 }
 0x3a1   :  { %v1655_v47 = vpop.eup %1654  ;;  %v1235_v35 = vadd.f32 %v1434_v17, %v1221_v32  ;;  %v1222_v62 = vmul.f32 %v1433_v31, %v1208_v48 }
 0x3a2   :  { %v1209_v37 = vmul.f32 %v1655_v47, %v1185_v9 }
 0x3a3   :  { %v1457_v29 = vpack.c.bf16 %v1235_v35, %v1234_v7  ;;  %v1236_v3 = vadd.f32 %v1434_v17, %v1222_v62 }
 0x3a4   :  { %v1223_v24 = vmul.f32 %v1433_v31, %v1209_v37 }
 0x3a5   :  { %1568 = vmatprep.mubr.msk.bf16.mxu1 %vm2886_vm11, %v1457_v29 }
 0x3a6   :  { %v1237_v11 = vadd.f32 %v1434_v17, %v1223_v24 }
 0x3a8   :  { %v1462_v22 = vpack.c.bf16 %v1237_v11, %v1236_v3 }
 0x3aa   :  { %1569 = vmatmul.mubr.msk.bf16.vlgmr.msra.gmra.mxu1 %vm1461_vm3, %v1462_v22 }
 0x45a   :  { %v1566_v25 = vpop.f32.mrf.mxu0 }
 0x45b   :  { %v1364_v49 = vadd.f32 %v1566_v25, %v1435_v27 }
 0x45c   :  { %v1355_v23 = vpop.f32.mrf.mxu0 }
 0x45d   :  { %1388 = vst [vmem:[#allocation11 + $0x10] sm:$0xff] %v1364_v49  ;;  %v1356_v56 = vadd.f32 %v1435_v27, %v1355_v23 }
 0x45e   :  { %v1567_v58 = vpop.f32.mrf.mxu0 }
 0x45f   :  { %1386 = vst [vmem:[#allocation11] sm:$0xff] %v1356_v56  ;;  %v1367_v34 = vadd.f32 %v1567_v58, %v1435_v27 }
 0x460   :  { %v1358_v2 = vpop.f32.mrf.mxu0 }
 0x461   :  { %1389 = vst [vmem:[#allocation11 + $0x18] sm:$0xff] %v1367_v34  ;;  %v1359_v19 = vadd.f32 %v1435_v27, %v1358_v2 }
 0x463   :  { %1387 = vst [vmem:[#allocation11 + $0x8] sm:$0xff] %v1359_v19 }
 0x46a   :  { %v1570_v21 = vpop.f32.mrf.mxu1 }
 0x46b   :  { %v1380_v39 = vadd.f32 %v1570_v21, %v1435_v27 }
 0x46c   :  { %v1371_v57 = vpop.f32.mrf.mxu1 }
 0x46d   :  { %1392 = vst [vmem:[#allocation11 + $0x30] sm:$0xff] %v1380_v39  ;;  %v1372_v26 = vadd.f32 %v1435_v27, %v1371_v57 }
 0x46e   :  { %v1571_v8 = vpop.f32.mrf.mxu1 }
 0x46f   :  { %1390 = vst [vmem:[#allocation11 + $0x20] sm:$0xff] %v1372_v26  ;;  %v1383_v38 = vadd.f32 %v1571_v8, %v1435_v27 }
 0x470   :  { %v1374_v15 = vpop.f32.mrf.mxu1 }
 0x471   :  { %1393 = vst [vmem:[#allocation11 + $0x38] sm:$0xff] %v1383_v38  ;;  %v1375_v1 = vadd.f32 %v1435_v27, %v1374_v15 }
 0x473   :  { %1391 = vst [vmem:[#allocation11 + $0x28] sm:$0xff] %v1375_v1 }
 0x474   :  { %1747 = shalt.err (!%p1744_p10)
}
 0x475   :  { %s1772_s22 = smov 128   ;;  %s1773_s23 = smov 8  }
 0x476   :  { %1405 = dma.vmem_to_hbm [thread:$0]  %s1400_s13, 1024, %s2811_s14, [#allocation5], %s1772_s22, %s1772_s22, %s1773_s23  }
 0x477   :  { %1762 = dma.done.wait [#allocation5], 1024  }
 0x478   :  { %1763 = vsyncadd [#allocation5], 4294966272 }
 0x479   :  { %1409 = vsyncpa [#allocation4], 1 }
 0x47a   :  { %1410 = vsyncpa [#allocation7], 1 }
 0x47b   :  { %1411 = vsyncpa [#allocation10], 1 }
 0x47c   :  { %1412 = vsyncpa [#allocation5], 1 }

</bundles_post_ra>
